<compile_context>
chip_gen: v7x
topology: tpu7x:2x2x1
jax: 0.10.0
libtpu: 0.0.40
codegen_flags: <defaults>
</compile_context>

<pallas_src>
import math
import functools
from collections import namedtuple

import numpy as np
import jax
import jax.numpy as jnp
from jax import lax
from jax.experimental import pallas as pl
from jax.experimental.pallas import tpu as pltpu

StageSpec = namedtuple("StageSpec", ["index", "block_count", "return_features"])


# ------------------------------ Pallas kernel -------------------------------

def _bottleneck_kernel(*refs, has_downsample):
    """Fused bottleneck block for a tile of `nb` images.

    conv1(1x1)+bn+relu -> conv2(3x3, pad 1)+bn+relu -> conv3(1x1)+bn
    (+ optional 1x1 downsample) + residual + relu.
    BN scale is pre-folded into the weights; b*_ref are the f32 shifts.
    All matmuls accumulate in f32 on the MXU.
    """
    if has_downsample:
        (x_ref, w1_ref, b1_ref, w2_ref, b2_ref, w3_ref, b3_ref,
         wd_ref, bd_ref, o_ref, pad_ref) = refs
    else:
        (x_ref, w1_ref, b1_ref, w2_ref, b2_ref, w3_ref, b3_ref,
         o_ref, pad_ref) = refs
        wd_ref = bd_ref = None

    nb, h, w, cin = x_ref.shape
    cmid = w1_ref.shape[1]
    cout = w3_ref.shape[1]
    m = nb * h * w

    x2d = x_ref[...].reshape(m, cin)

    # --- conv1: 1x1 (BN scale folded into w1) + shift + relu ----------------
    y1 = jnp.dot(x2d, w1_ref[...], preferred_element_type=jnp.float32)
    y1 = jnp.maximum(y1 + b1_ref[...], 0.0)

    # --- conv2: 3x3 / stride 1 / pad 1 as ONE im2col matmul (K = 9*cmid) ----
    # The padded conv1 output lives in VMEM scratch; only the 1-pixel halo is
    # re-zeroed each step (the interior is fully overwritten below). The 9
    # taps are static slices of that resident buffer, so no shifted copies
    # ever touch HBM.
    pdt = pad_ref.dtype
    pad_ref[:, 0:1, :, :] = jnp.zeros((nb, 1, w + 2, cmid), pdt)
    pad_ref[:, h + 1:h + 2, :, :] = jnp.zeros((nb, 1, w + 2, cmid), pdt)
    pad_ref[:, 1:h + 1, 0:1, :] = jnp.zeros((nb, h, 1, cmid), pdt)
    pad_ref[:, 1:h + 1, w + 1:w + 2, :] = jnp.zeros((nb, h, 1, cmid), pdt)
    pad_ref[:, 1:h + 1, 1:w + 1, :] = y1.reshape(nb, h, w, cmid)

    cdt = w2_ref.dtype
    taps = [pad_ref[:, ky:ky + h, kx:kx + w, :].astype(cdt)
            for ky in range(3) for kx in range(3)]
    im2col = jnp.concatenate(taps, axis=-1).reshape(m, 9 * cmid)
    y2 = jnp.dot(im2col, w2_ref[...], preferred_element_type=jnp.float32)
    y2 = jnp.maximum(y2 + b2_ref[...], 0.0)

    # --- conv3: 1x1 + shift, residual (optional 1x1 downsample), relu -------
    y3 = jnp.dot(y2.astype(w3_ref.dtype), w3_ref[...],
                 preferred_element_type=jnp.float32) + b3_ref[...]
    if has_downsample:
        identity = jnp.dot(x2d, wd_ref[...],
                           preferred_element_type=jnp.float32) + bd_ref[...]
    else:
        identity = x2d.astype(jnp.float32)           # cin == cout here
    out = jnp.maximum(y3 + identity, 0.0)
    o_ref[...] = out.reshape(nb, h, w, cout).astype(o_ref.dtype)


# ------------------------------ kernel wrapper -------------------------------

def _pick_images_per_block(n, h, w, cin, cmid, cout, act_itemsize,
                           budget_bytes=48 << 20):
    """Largest batch tile (divisor of n) whose fused-kernel working set fits a
    per-generation VMEM budget (48 MiB leaves headroom on v7x's 64 MiB)."""
    m = h * w
    per_image = (
        2 * m * (cin + cout) * act_itemsize           # double-buffered in/out blocks
        + (h + 2) * (w + 2) * cmid * 4                # f32 padded conv2-input scratch
        + m * 9 * cmid * act_itemsize                 # in-kernel im2col operand
        + 2 * m * (cmid + cout) * 4                   # live f32 intermediates
    )
    nb = max(1, min(n, int(budget_bytes // max(per_image, 1))))
    while n % nb:
        nb -= 1
    return nb


def _prepare_block(p, dtype):
    """Fold FrozenBN scale into conv weights (exact) and lay the 3x3 weight
    out as a (9*Cmid, Cmid) im2col matrix. Shifts stay f32."""
    cmid = p['w1'].shape[1]
    cout = p['w3'].shape[1]
    w1 = (p['w1'] * p['s1'][None, :]).astype(dtype)
    w2 = (p['w2'] * p['s2'][None, None, None, :]).reshape(9 * cmid, cmid).astype(dtype)
    w3 = (p['w3'] * p['s3'][None, :]).astype(dtype)
    b1 = p['b1'].reshape(1, cmid).astype(jnp.float32)
    b2 = p['b2'].reshape(1, cmid).astype(jnp.float32)
    b3 = p['b3'].reshape(1, cout).astype(jnp.float32)
    if p['wd'] is not None:
        wd = (p['wd'] * p['sd'][None, :]).astype(dtype)
        bd = p['bd'].reshape(1, cout).astype(jnp.float32)
    else:
        wd, bd = None, None
    return w1, b1, w2, b2, w3, b3, wd, bd


def bottleneck_forward(x, p, *, dtype=jnp.float32, images_per_block=None):
    """x: (N, H, W, Cin) NHWC activation in `dtype`. Returns NHWC output."""
    stride = p['stride']
    n, _, _, cin = x.shape
    if p['wd'] is None:
        # Residual uses the input directly; only valid when spatial dims match.
        assert stride == 1, "stride > 1 without a downsample branch"
    # Strided 1x1 conv == spatial subsample + channel matmul (exact). The
    # subsample is a single XLA strided slice on the NHWC tensor (4x smaller
    # DMA into the kernel). TODO(synk): fold the subsample into the kernel's
    # input access (strided VMEM read) to remove this one extra pass as well.
    xs = x[:, ::stride, ::stride, :] if stride > 1 else x
    _, h, w, _ = xs.shape

    w1, b1, w2, b2, w3, b3, wd, bd = _prepare_block(p, dtype)
    cmid = w1.shape[1]
    cout = w3.shape[1]
    has_down = wd is not None
    if not has_down:
        assert cin == cout, "identity path requires cin == cout"

    act_itemsize = np.dtype(dtype).itemsize
    nb = images_per_block or _pick_images_per_block(
        n, h, w, cin, cmid, cout, act_itemsize)
    assert n % nb == 0, (n, nb)
    grid = (n // nb,)

    def _const_spec(a):
        # Whole weight resident in VMEM; constant block index -> no re-DMA.
        return pl.BlockSpec(a.shape, lambda i: (0, 0))

    inputs = [xs, w1, b1, w2, b2, w3, b3]
    in_specs = [pl.BlockSpec((nb, h, w, cin), lambda i: (i, 0, 0, 0))]
    in_specs += [_const_spec(a) for a in inputs[1:]]
    if has_down:
        inputs += [wd, bd]
        in_specs += [_const_spec(wd), _const_spec(bd)]

    # Explicit VMEM budget: blocks (double-buffered) + weights + scratch + slack.
    block_bytes = nb * h * w * (cin + cout) * act_itemsize
    weight_bytes = sum(int(np.prod(a.shape)) * a.dtype.itemsize
                       for a in inputs[1:])
    scratch_bytes = nb * (h + 2) * (w + 2) * cmid * 4
    im2col_bytes = nb * h * w * 9 * cmid * act_itemsize
    vmem_limit = int(min(64 << 20,
                         max(32 << 20,
                             2 * block_bytes + 2 * weight_bytes
                             + scratch_bytes + im2col_bytes + (8 << 20))))

    return pl.pallas_call(
        functools.partial(_bottleneck_kernel, has_downsample=has_down),
        out_shape=jax.ShapeDtypeStruct((n, h, w, cout), dtype),
        grid=grid,
        in_specs=in_specs,
        out_specs=pl.BlockSpec((nb, h, w, cout), lambda i: (i, 0, 0, 0)),
        scratch_shapes=[pltpu.VMEM((nb, h + 2, w + 2, cmid), jnp.float32)],
        compiler_params=pltpu.CompilerParams(
            dimension_semantics=("parallel",),   # shard batch tiles over TCs
            vmem_limit_bytes=vmem_limit),
    )(*inputs)


def resnet_head_forward(x_nchw, blocks, *, dtype=jnp.float32,
                        images_per_block=None):
    # NHWC internally; transpose exactly once at each API boundary.
    x = jnp.transpose(x_nchw, (0, 2, 3, 1)).astype(dtype)
    for p in blocks:
        x = bottleneck_forward(x, p, dtype=dtype,
                               images_per_block=images_per_block)
    return jnp.transpose(x, (0, 3, 1, 2))


# --------------------------- parameter construction --------------------------

def kaiming_uniform(key, shape, fan_in, a=1.0):
    bound = math.sqrt(6.0 / ((1.0 + a * a) * fan_in))
    return jax.random.uniform(key, shape, jnp.float32, -bound, bound)


def frozen_bn(key, c):
    # FrozenBatchNorm2d: y = x * (weight * rsqrt(running_var)) + (bias - mean*scale)
    k1, k2, k3, k4 = jax.random.split(key, 4)
    weight = jax.random.uniform(k1, (c,), jnp.float32, 0.5, 1.5)
    bias = jax.random.uniform(k2, (c,), jnp.float32, -0.5, 0.5)
    mean = jax.random.uniform(k3, (c,), jnp.float32, -0.5, 0.5)
    var = jax.random.uniform(k4, (c,), jnp.float32, 0.5, 1.5)
    scale = weight * lax.rsqrt(var)
    shift = bias - mean * scale
    return scale, shift


def make_bottleneck_params(key, in_c, bott_c, out_c, stride):
    keys = jax.random.split(key, 8)
    p = {'stride': stride}
    if in_c != out_c:
        p['wd'] = kaiming_uniform(keys[0], (in_c, out_c), in_c)            # 1x1 downsample
        p['sd'], p['bd'] = frozen_bn(keys[1], out_c)
    else:
        p['wd'] = None
    p['w1'] = kaiming_uniform(keys[2], (in_c, bott_c), in_c)               # 1x1
    p['s1'], p['b1'] = frozen_bn(keys[3], bott_c)
    p['w2'] = kaiming_uniform(keys[4], (3, 3, bott_c, bott_c), bott_c * 9)  # 3x3 (HWIO)
    p['s2'], p['b2'] = frozen_bn(keys[5], bott_c)
    p['w3'] = kaiming_uniform(keys[6], (bott_c, out_c), bott_c)            # 1x1
    p['s3'], p['b3'] = frozen_bn(keys[7], out_c)
    return p


def make_resnet_head_params(key, stages, num_groups=1, width_per_group=64,
                            stride_in_1x1=True, stride_init=None,
                            res2_out_channels=256, dilation=1):
    assert stride_in_1x1 and dilation == 1 and num_groups == 1
    factor = 2 ** (stages[0].index - 1)
    stage2_bottleneck = num_groups * width_per_group
    out_channels = res2_out_channels * factor
    in_channels = out_channels // 2
    bottleneck_channels = stage2_bottleneck * factor
    blocks = []
    stride = stride_init
    for stage in stages:
        if not stride:
            stride = int(stage.index > 1) + 1
        s = stride
        ic = in_channels
        for _ in range(stage.block_count):
            key, bk = jax.random.split(key)
            blocks.append(make_bottleneck_params(bk, ic, bottleneck_channels,
                                                 out_channels, s))
            s = 1
            ic = out_channels
        stride = None
    return blocks, out_channels


# ------------------------------ pure-JAX reference ---------------------------

def _ref_conv1x1(x, w, stride):
    return lax.conv_general_dilated(
        x, w[None, None, :, :], (stride, stride), 'VALID',
        dimension_numbers=('NHWC', 'HWIO', 'NHWC'),
        precision=lax.Precision.HIGHEST)


def _ref_conv3x3(x, w):
    return lax.conv_general_dilated(
        x, w, (1, 1), ((1, 1), (1, 1)),
        dimension_numbers=('NHWC', 'HWIO', 'NHWC'),
        precision=lax.Precision.HIGHEST)


def ref_forward(x_nchw, blocks):
    x = jnp.transpose(x_nchw, (0, 2, 3, 1))
    for p in blocks:
        s = p['stride']
        identity = x
        y = jnp.maximum(_ref_conv1x1(x, p['w1'], s) * p['s1'] + p['b1'], 0.0)
        y = jnp.maximum(_ref_conv3x3(y, p['w2']) * p['s2'] + p['b2'], 0.0)
        y = _ref_conv1x1(y, p['w3'], 1) * p['s3'] + p['b3']
        if p['wd'] is not None:
            identity = _ref_conv1x1(x, p['wd'], s) * p['sd'] + p['bd']
        x = jnp.maximum(y + identity, 0.0)
    return jnp.transpose(x, (0, 3, 1, 2))


# ----------------------------------- main -------------------------------------

if __name__ == "__main__":
    key = jax.random.PRNGKey(0)
    kx, kp = jax.random.split(key)

    # Small synthetic ResNetHead: stage index 2, 2 bottleneck blocks.
    stages = (StageSpec(index=2, block_count=2, return_features=False),)
    blocks, out_channels = make_resnet_head_params(
        kp, stages, num_groups=1, width_per_group=8,
        stride_in_1x1=True, stride_init=None, res2_out_channels=16, dilation=1)
    in_channels = out_channels // 2   # 16

    n = 4
    # PyTorch-convention NCHW input.
    x = jax.random.normal(kx, (n, in_channels, 16, 16), jnp.float32)

    ref = jax.block_until_ready(ref_forward(x, blocks))

    # f32 path; images_per_block=2 -> a 2-step batch grid (exercises pipelining
    # / "parallel" sharding and the per-step halo re-zeroing).
    out = jax.block_until_ready(
        resnet_head_forward(x, blocks, dtype=jnp.float32, images_per_block=2))
    assert out.shape == (n, out_channels, 8, 8), out.shape
    max_err = float(np.max(np.abs(np.asarray(out) - np.asarray(ref))))
    assert np.allclose(np.asarray(out), np.asarray(ref),
                       atol=1e-2, rtol=1e-2), max_err

    # bf16 weights/activations (f32 MXU accumulation), auto batch-tile sizing.
    out_bf16 = jax.block_until_ready(
        resnet_head_forward(x, blocks, dtype=jnp.bfloat16))
    out_bf16 = np.asarray(out_bf16.astype(jnp.float32))
    assert out_bf16.shape == (n, out_channels, 8, 8), out_bf16.shape
    max_err_bf16 = float(np.max(np.abs(out_bf16 - np.asarray(ref))))
    assert np.allclose(out_bf16, np.asarray(ref),
                       atol=2.5e-1, rtol=1e-1), max_err_bf16

    print("KERNEL_OK")
</pallas_src>

<mosaic_0001>
module attributes {stable_mosaic.version = 11 : i64} {
  func.func @_bottleneck_kernel(%arg0: i32, %arg1: memref<2x8x8x16xf32, #tpu.memory_space<vmem>>, %arg2: memref<16x16xf32, #tpu.memory_space<vmem>>, %arg3: memref<1x16xf32, #tpu.memory_space<vmem>>, %arg4: memref<144x16xf32, #tpu.memory_space<vmem>>, %arg5: memref<1x16xf32, #tpu.memory_space<vmem>>, %arg6: memref<16x32xf32, #tpu.memory_space<vmem>>, %arg7: memref<1x32xf32, #tpu.memory_space<vmem>>, %arg8: memref<16x32xf32, #tpu.memory_space<vmem>>, %arg9: memref<1x32xf32, #tpu.memory_space<vmem>>, %arg10: memref<2x8x8x32xf32, #tpu.memory_space<vmem>>, %arg11: memref<2x10x10x16xf32, #tpu.memory_space<vmem>>) attributes {dimension_semantics = [#tpu.dimension_semantics<parallel>], iteration_bounds = array<i64: 2>, scalar_prefetch = 0 : i64, scratch_operands = 1 : i64, tpu.core_type = #tpu.core_type<tc>, window_params = [{transform_indices = @transform_0, window_bounds = array<i64: 2, 8, 8, 16>}, {pipeline_mode = #tpu.pipeline_mode<synchronous>, transform_indices = @transform_1, window_bounds = array<i64: 16, 16>}, {pipeline_mode = #tpu.pipeline_mode<synchronous>, transform_indices = @transform_2, window_bounds = array<i64: 1, 16>}, {pipeline_mode = #tpu.pipeline_mode<synchronous>, transform_indices = @transform_3, window_bounds = array<i64: 144, 16>}, {pipeline_mode = #tpu.pipeline_mode<synchronous>, transform_indices = @transform_4, window_bounds = array<i64: 1, 16>}, {pipeline_mode = #tpu.pipeline_mode<synchronous>, transform_indices = @transform_5, window_bounds = array<i64: 16, 32>}, {pipeline_mode = #tpu.pipeline_mode<synchronous>, transform_indices = @transform_6, window_bounds = array<i64: 1, 32>}, {pipeline_mode = #tpu.pipeline_mode<synchronous>, transform_indices = @transform_7, window_bounds = array<i64: 16, 32>}, {pipeline_mode = #tpu.pipeline_mode<synchronous>, transform_indices = @transform_8, window_bounds = array<i64: 1, 32>}, {transform_indices = @transform_9, window_bounds = array<i64: 2, 8, 8, 32>}]} {
    %c0 = arith.constant 0 : index
    %c0_0 = arith.constant 0 : index
    %c0_1 = arith.constant 0 : index
    %c0_2 = arith.constant 0 : index
    %0 = vector.load %arg1[%c0, %c0_0, %c0_1, %c0_2] : memref<2x8x8x16xf32, #tpu.memory_space<vmem>>, vector<2x8x8x16xf32>
    %1 = vector.shape_cast %0 : vector<2x8x8x16xf32> to vector<128x16xf32>
    %c0_3 = arith.constant 0 : index
    %c0_4 = arith.constant 0 : index
    %2 = vector.load %arg2[%c0_3, %c0_4] : memref<16x16xf32, #tpu.memory_space<vmem>>, vector<16x16xf32>
    %cst = arith.constant dense<0.000000e+00> : vector<128x16xf32>
    %3 = tpu.matmul %1, %2, %cst {dimension_numbers = #tpu.dot_dimension_numbers<[1], [0], [0], [1], [0, 0, 1, 1], [], []>} : vector<128x16xf32>, vector<16x16xf32>, vector<128x16xf32> -> vector<128x16xf32>
    %c0_5 = arith.constant 0 : index
    %c0_6 = arith.constant 0 : index
    %4 = vector.load %arg3[%c0_5, %c0_6] : memref<1x16xf32, #tpu.memory_space<vmem>>, vector<1x16xf32>
    %5 = vector.broadcast %4 : vector<1x16xf32> to vector<128x16xf32>
    %6 = arith.addf %3, %5 : vector<128x16xf32>
    %cst_7 = arith.constant 0.000000e+00 : f32
    %7 = vector.broadcast %cst_7 : f32 to vector<128x16xf32>
    %8 = arith.maximumf %6, %7 : vector<128x16xf32>
    %cst_8 = arith.constant 0.000000e+00 : f32
    %9 = vector.broadcast %cst_8 : f32 to vector<2x1x10x16xf32>
    %c0_9 = arith.constant 0 : index
    %c0_10 = arith.constant 0 : index
    %c0_11 = arith.constant 0 : index
    %c0_12 = arith.constant 0 : index
    %10 = vector.load %arg11[%c0_9, %c0_10, %c0_11, %c0_12] : memref<2x10x10x16xf32, #tpu.memory_space<vmem>>, vector<2x1x10x16xf32>
    tpu.vector_store %arg11[%c0_9, %c0_10, %c0_11, %c0_12], %9 {strides = array<i32>} : memref<2x10x10x16xf32, #tpu.memory_space<vmem>>, vector<2x1x10x16xf32>,
    %cst_13 = arith.constant 0.000000e+00 : f32
    %11 = vector.broadcast %cst_13 : f32 to vector<2x1x10x16xf32>
    %c0_14 = arith.constant 0 : index
    %c9 = arith.constant 9 : index
    %c0_15 = arith.constant 0 : index
    %c0_16 = arith.constant 0 : index
    %12 = vector.load %arg11[%c0_14, %c9, %c0_15, %c0_16] : memref<2x10x10x16xf32, #tpu.memory_space<vmem>>, vector<2x1x10x16xf32>
    tpu.vector_store %arg11[%c0_14, %c9, %c0_15, %c0_16], %11 {strides = array<i32>} : memref<2x10x10x16xf32, #tpu.memory_space<vmem>>, vector<2x1x10x16xf32>,
    %cst_17 = arith.constant 0.000000e+00 : f32
    %13 = vector.broadcast %cst_17 : f32 to vector<2x8x1x16xf32>
    %c0_18 = arith.constant 0 : index
    %c1 = arith.constant 1 : index
    %c0_19 = arith.constant 0 : index
    %c0_20 = arith.constant 0 : index
    %14 = vector.load %arg11[%c0_18, %c1, %c0_19, %c0_20] : memref<2x10x10x16xf32, #tpu.memory_space<vmem>>, vector<2x8x1x16xf32>
    tpu.vector_store %arg11[%c0_18, %c1, %c0_19, %c0_20], %13 {strides = array<i32>} : memref<2x10x10x16xf32, #tpu.memory_space<vmem>>, vector<2x8x1x16xf32>,
    %cst_21 = arith.constant 0.000000e+00 : f32
    %15 = vector.broadcast %cst_21 : f32 to vector<2x8x1x16xf32>
    %c0_22 = arith.constant 0 : index
    %c1_23 = arith.constant 1 : index
    %c9_24 = arith.constant 9 : index
    %c0_25 = arith.constant 0 : index
    %16 = vector.load %arg11[%c0_22, %c1_23, %c9_24, %c0_25] : memref<2x10x10x16xf32, #tpu.memory_space<vmem>>, vector<2x8x1x16xf32>
    tpu.vector_store %arg11[%c0_22, %c1_23, %c9_24, %c0_25], %15 {strides = array<i32>} : memref<2x10x10x16xf32, #tpu.memory_space<vmem>>, vector<2x8x1x16xf32>,
    %17 = vector.shape_cast %8 : vector<128x16xf32> to vector<2x8x8x16xf32>
    %c0_26 = arith.constant 0 : index
    %c1_27 = arith.constant 1 : index
    %c1_28 = arith.constant 1 : index
    %c0_29 = arith.constant 0 : index
    %18 = vector.load %arg11[%c0_26, %c1_27, %c1_28, %c0_29] : memref<2x10x10x16xf32, #tpu.memory_space<vmem>>, vector<2x8x8x16xf32>
    tpu.vector_store %arg11[%c0_26, %c1_27, %c1_28, %c0_29], %17 {strides = array<i32>} : memref<2x10x10x16xf32, #tpu.memory_space<vmem>>, vector<2x8x8x16xf32>,
    %c0_30 = arith.constant 0 : index
    %c0_31 = arith.constant 0 : index
    %c0_32 = arith.constant 0 : index
    %c0_33 = arith.constant 0 : index
    %19 = vector.load %arg11[%c0_30, %c0_31, %c0_32, %c0_33] : memref<2x10x10x16xf32, #tpu.memory_space<vmem>>, vector<2x8x8x16xf32>
    %c0_34 = arith.constant 0 : index
    %c0_35 = arith.constant 0 : index
    %c1_36 = arith.constant 1 : index
    %c0_37 = arith.constant 0 : index
    %20 = vector.load %arg11[%c0_34, %c0_35, %c1_36, %c0_37] : memref<2x10x10x16xf32, #tpu.memory_space<vmem>>, vector<2x8x8x16xf32>
    %c0_38 = arith.constant 0 : index
    %c0_39 = arith.constant 0 : index
    %c2 = arith.constant 2 : index
    %c0_40 = arith.constant 0 : index
    %21 = vector.load %arg11[%c0_38, %c0_39, %c2, %c0_40] : memref<2x10x10x16xf32, #tpu.memory_space<vmem>>, vector<2x8x8x16xf32>
    %c0_41 = arith.constant 0 : index
    %c1_42 = arith.constant 1 : index
    %c0_43 = arith.constant 0 : index
    %c0_44 = arith.constant 0 : index
    %22 = vector.load %arg11[%c0_41, %c1_42, %c0_43, %c0_44] : memref<2x10x10x16xf32, #tpu.memory_space<vmem>>, vector<2x8x8x16xf32>
    %c0_45 = arith.constant 0 : index
    %c1_46 = arith.constant 1 : index
    %c1_47 = arith.constant 1 : index
    %c0_48 = arith.constant 0 : index
    %23 = vector.load %arg11[%c0_45, %c1_46, %c1_47, %c0_48] : memref<2x10x10x16xf32, #tpu.memory_space<vmem>>, vector<2x8x8x16xf32>
    %c0_49 = arith.constant 0 : index
    %c1_50 = arith.constant 1 : index
    %c2_51 = arith.constant 2 : index
    %c0_52 = arith.constant 0 : index
    %24 = vector.load %arg11[%c0_49, %c1_50, %c2_51, %c0_52] : memref<2x10x10x16xf32, #tpu.memory_space<vmem>>, vector<2x8x8x16xf32>
    %c0_53 = arith.constant 0 : index
    %c2_54 = arith.constant 2 : index
    %c0_55 = arith.constant 0 : index
    %c0_56 = arith.constant 0 : index
    %25 = vector.load %arg11[%c0_53, %c2_54, %c0_55, %c0_56] : memref<2x10x10x16xf32, #tpu.memory_space<vmem>>, vector<2x8x8x16xf32>
    %c0_57 = arith.constant 0 : index
    %c2_58 = arith.constant 2 : index
    %c1_59 = arith.constant 1 : index
    %c0_60 = arith.constant 0 : index
    %26 = vector.load %arg11[%c0_57, %c2_58, %c1_59, %c0_60] : memref<2x10x10x16xf32, #tpu.memory_space<vmem>>, vector<2x8x8x16xf32>
    %c0_61 = arith.constant 0 : index
    %c2_62 = arith.constant 2 : index
    %c2_63 = arith.constant 2 : index
    %c0_64 = arith.constant 0 : index
    %27 = vector.load %arg11[%c0_61, %c2_62, %c2_63, %c0_64] : memref<2x10x10x16xf32, #tpu.memory_space<vmem>>, vector<2x8x8x16xf32>
    %28 = tpu.concatenate %19, %20, %21, %22, %23, %24, %25, %26, %27 in 3 : vector<2x8x8x16xf32>, vector<2x8x8x16xf32>, vector<2x8x8x16xf32>, vector<2x8x8x16xf32>, vector<2x8x8x16xf32>, vector<2x8x8x16xf32>, vector<2x8x8x16xf32>, vector<2x8x8x16xf32>, vector<2x8x8x16xf32> -> vector<2x8x8x144xf32>
    %29 = vector.shape_cast %28 : vector<2x8x8x144xf32> to vector<128x144xf32>
    %c0_65 = arith.constant 0 : index
    %c0_66 = arith.constant 0 : index
    %30 = vector.load %arg4[%c0_65, %c0_66] : memref<144x16xf32, #tpu.memory_space<vmem>>, vector<144x16xf32>
    %cst_67 = arith.constant dense<0.000000e+00> : vector<128x16xf32>
    %31 = tpu.matmul %29, %30, %cst_67 {dimension_numbers = #tpu.dot_dimension_numbers<[1], [0], [0], [1], [0, 0, 1, 1], [], []>} : vector<128x144xf32>, vector<144x16xf32>, vector<128x16xf32> -> vector<128x16xf32>
    %c0_68 = arith.constant 0 : index
    %c0_69 = arith.constant 0 : index
    %32 = vector.load %arg5[%c0_68, %c0_69] : memref<1x16xf32, #tpu.memory_space<vmem>>, vector<1x16xf32>
    %33 = vector.broadcast %32 : vector<1x16xf32> to vector<128x16xf32>
    %34 = arith.addf %31, %33 : vector<128x16xf32>
    %cst_70 = arith.constant 0.000000e+00 : f32
    %35 = vector.broadcast %cst_70 : f32 to vector<128x16xf32>
    %36 = arith.maximumf %34, %35 : vector<128x16xf32>
    %c0_71 = arith.constant 0 : index
    %c0_72 = arith.constant 0 : index
    %37 = vector.load %arg6[%c0_71, %c0_72] : memref<16x32xf32, #tpu.memory_space<vmem>>, vector<16x32xf32>
    %cst_73 = arith.constant dense<0.000000e+00> : vector<128x32xf32>
    %38 = tpu.matmul %36, %37, %cst_73 {dimension_numbers = #tpu.dot_dimension_numbers<[1], [0], [0], [1], [0, 0, 1, 1], [], []>} : vector<128x16xf32>, vector<16x32xf32>, vector<128x32xf32> -> vector<128x32xf32>
    %c0_74 = arith.constant 0 : index
    %c0_75 = arith.constant 0 : index
    %39 = vector.load %arg7[%c0_74, %c0_75] : memref<1x32xf32, #tpu.memory_space<vmem>>, vector<1x32xf32>
    %40 = vector.broadcast %39 : vector<1x32xf32> to vector<128x32xf32>
    %41 = arith.addf %38, %40 : vector<128x32xf32>
    %c0_76 = arith.constant 0 : index
    %c0_77 = arith.constant 0 : index
    %42 = vector.load %arg8[%c0_76, %c0_77] : memref<16x32xf32, #tpu.memory_space<vmem>>, vector<16x32xf32>
    %cst_78 = arith.constant dense<0.000000e+00> : vector<128x32xf32>
    %43 = tpu.matmul %1, %42, %cst_78 {dimension_numbers = #tpu.dot_dimension_numbers<[1], [0], [0], [1], [0, 0, 1, 1], [], []>} : vector<128x16xf32>, vector<16x32xf32>, vector<128x32xf32> -> vector<128x32xf32>
    %c0_79 = arith.constant 0 : index
    %c0_80 = arith.constant 0 : index
    %44 = vector.load %arg9[%c0_79, %c0_80] : memref<1x32xf32, #tpu.memory_space<vmem>>, vector<1x32xf32>
    %45 = vector.broadcast %44 : vector<1x32xf32> to vector<128x32xf32>
    %46 = arith.addf %43, %45 : vector<128x32xf32>
    %47 = arith.addf %41, %46 : vector<128x32xf32>
    %cst_81 = arith.constant 0.000000e+00 : f32
    %48 = vector.broadcast %cst_81 : f32 to vector<128x32xf32>
    %49 = arith.maximumf %47, %48 : vector<128x32xf32>
    %50 = vector.shape_cast %49 : vector<128x32xf32> to vector<2x8x8x32xf32>
    %c0_82 = arith.constant 0 : index
    %c0_83 = arith.constant 0 : index
    %c0_84 = arith.constant 0 : index
    %c0_85 = arith.constant 0 : index
    %51 = vector.load %arg10[%c0_82, %c0_83, %c0_84, %c0_85] : memref<2x8x8x32xf32, #tpu.memory_space<vmem>>, vector<2x8x8x32xf32>
    tpu.vector_store %arg10[%c0_82, %c0_83, %c0_84, %c0_85], %50 {strides = array<i32>} : memref<2x8x8x32xf32, #tpu.memory_space<vmem>>, vector<2x8x8x32xf32>,
    return
  }
  func.func @transform_0(%arg0: i32) -> (i32, i32, i32, i32) {
    %c0_i32 = arith.constant 0 : i32
    %c0_i32_0 = arith.constant 0 : i32
    %c0_i32_1 = arith.constant 0 : i32
    %c0_i32_2 = arith.constant 0 : i32
    return %arg0, %c0_i32, %c0_i32_0, %c0_i32_1 : i32, i32, i32, i32
  }
  func.func @transform_1(%arg0: i32) -> (i32, i32) {
    %c0_i32 = arith.constant 0 : i32
    %c0_i32_0 = arith.constant 0 : i32
    %c0_i32_1 = arith.constant 0 : i32
    return %c0_i32, %c0_i32_0 : i32, i32
  }
  func.func @transform_2(%arg0: i32) -> (i32, i32) {
    %c0_i32 = arith.constant 0 : i32
    %c0_i32_0 = arith.constant 0 : i32
    %c0_i32_1 = arith.constant 0 : i32
    return %c0_i32, %c0_i32_0 : i32, i32
  }
  func.func @transform_3(%arg0: i32) -> (i32, i32) {
    %c0_i32 = arith.constant 0 : i32
    %c0_i32_0 = arith.constant 0 : i32
    %c0_i32_1 = arith.constant 0 : i32
    return %c0_i32, %c0_i32_0 : i32, i32
  }
  func.func @transform_4(%arg0: i32) -> (i32, i32) {
    %c0_i32 = arith.constant 0 : i32
    %c0_i32_0 = arith.constant 0 : i32
    %c0_i32_1 = arith.constant 0 : i32
    return %c0_i32, %c0_i32_0 : i32, i32
  }
  func.func @transform_5(%arg0: i32) -> (i32, i32) {
    %c0_i32 = arith.constant 0 : i32
    %c0_i32_0 = arith.constant 0 : i32
    %c0_i32_1 = arith.constant 0 : i32
    return %c0_i32, %c0_i32_0 : i32, i32
  }
  func.func @transform_6(%arg0: i32) -> (i32, i32) {
    %c0_i32 = arith.constant 0 : i32
    %c0_i32_0 = arith.constant 0 : i32
    %c0_i32_1 = arith.constant 0 : i32
    return %c0_i32, %c0_i32_0 : i32, i32
  }
  func.func @transform_7(%arg0: i32) -> (i32, i32) {
    %c0_i32 = arith.constant 0 : i32
    %c0_i32_0 = arith.constant 0 : i32
    %c0_i32_1 = arith.constant 0 : i32
    return %c0_i32, %c0_i32_0 : i32, i32
  }
  func.func @transform_8(%arg0: i32) -> (i32, i32) {
    %c0_i32 = arith.constant 0 : i32
    %c0_i32_0 = arith.constant 0 : i32
    %c0_i32_1 = arith.constant 0 : i32
    return %c0_i32, %c0_i32_0 : i32, i32
  }
  func.func @transform_9(%arg0: i32) -> (i32, i32, i32, i32) {
    %c0_i32 = arith.constant 0 : i32
    %c0_i32_0 = arith.constant 0 : i32
    %c0_i32_1 = arith.constant 0 : i32
    %c0_i32_2 = arith.constant 0 : i32
    return %arg0, %c0_i32, %c0_i32_0, %c0_i32_1 : i32, i32, i32, i32
  }
}

</mosaic_0001>

<bundles_post_ra>
// kernel: tpu_custom_call.1
= control target key start
LH: loop header
LB: loop body
LE: loop exit
PB: predicated region body
PF: predicated region fallthrough
CT: control target
= control target key end

     0   :  { %14 = vsyncpa [#allocation4], 0  ;;  %s3713_s0 = inlined_call_operand.hbm [shape: f32[4,8,8,16], index: 0, kind: input, shape index: {}]   ;;  %s3714_s1 = inlined_call_operand.vmem [shape: f32[16,16], index: 1, kind: input, shape index: {}]   ;;  %s3715_s2 = inlined_call_operand.vmem [shape: f32[1,16], index: 2, kind: input, shape index: {}]   ;;  %s3716_s3 = inlined_call_operand.vmem [shape: f32[144,16], index: 3, kind: input, shape index: {}]   ;;  %s3717_s4 = inlined_call_operand.vmem [shape: f32[1,16], index: 4, kind: input, shape index: {}]   ;;  %s3718_s5 = inlined_call_operand.vmem [shape: f32[16,32], index: 5, kind: input, shape index: {}]   ;;  %s3719_s6 = inlined_call_operand.vmem [shape: f32[1,32], index: 6, kind: input, shape index: {}]   ;;  %s3720_s7 = inlined_call_operand.vmem [shape: f32[16,32], index: 7, kind: input, shape index: {}]   ;;  %s3721_s8 = inlined_call_operand.vmem [shape: f32[1,32], index: 8, kind: input, shape index: {}]   ;;  %s3722_s9 = inlined_call_operand.hbm [shape: f32[4,8,8,32], index: 9, kind: output, shape index: {}]  }
   0x1   :  { %16 = vsyncpa [#allocation4 + $0x1], 0 }
   0x2   :  { %17 = vsyncpa [#allocation5], 0 }
   0x3   :  { %19 = vsyncpa [#allocation5 + $0x1], 0  ;;  %s2902_s30 = smov 0   ;;  %s2904_s10 = smov 0  }
   0x4   :  { %s2906_s11 = smov 0   ;;  %s2908_s12 = smov 0  }
   0x5 LB: > { %s2923_s13 = sadd.s32 4294967295, %s2835_s12   ;;  %s2086_s14 = sadd.s32 4294967294, %s2835_s12   ;;  %s2835_s12 = sphi %s2908_s12, %s3735_s12   ;;  %s2831_s11 = sphi %s2906_s11, %s3734_s11   ;;  %s2827_s10 = sphi %s2904_s10, %s3733_s10   ;;  %s2823_s30 = sphi %s2902_s30, %s3732_s30  }
   0x6   : > { %s2927_s15 = sadd.s32 1, %s2835_s12   ;;  %s32_s16 = sadd.s32 1, %s2831_s11 }
   0x7   : > { %s29_s17 = ssub.s32 %s2835_s12, %s2927_s15  ;;  %p39_p0 = scmp.ne.s32.totalorder %s2831_s11, %s2827_s10 }
   0x8   : > { %p30_p1 = scmp.eq.s32.totalorder %s29_s17, 0  ;;  %p40_p2 = scmp.eq.s32.totalorder %s2835_s12, 0 }
   0x9   : > { %p45_p3 = scmp.ne.s32.totalorder %s2827_s10, %s2823_s30  ;;  %p46_p4 = scmp.eq.s32.totalorder %s2923_s13, 0 }
   0xa   : > { %s2939_s18 = scalar_select %p30_p1, %s2831_s11, %s32_s16  }
   0xb   : > { %p2941_p5 = por %p40_p2, %p39_p0  ;;  %p2945_p6 = por %p46_p4, %p45_p3 }
   0xc   : > { %p237_p7 = scmp.eq.s32.totalorder %s2923_s13, 1  ;;  %p243_p8 = scmp.eq.s32.totalorder %s2086_s14, 1 }
   0xd   : > { %p2411_p10 = scmp.lt.s32.totalorder %s2835_s12, 2  ;;  %s287_s23 = sand.u32 1, %s2831_s11  }
   0xe   : > { %p2952_p11 = por %p237_p7, %p39_p0  ;;  %p2956_p12 = por %p243_p8, %p45_p3 }
   0xf   : > { %s2171_s24 = sshll.u32 %s2835_s12, 11  ;;  %s2089_s25 = sshll.u32 %s287_s23, 7 }
  0x10   : > { %s3726_s21 = scalar_select %p2952_p11, 1, 0 }
  0x11   : > { %s3727_s22 = scalar_select %p2956_p12, 1, 0 }
  0x12   : > { %s2965_s28 = scalar_lea.hbm %s3713_s0, %s2171_s24  ;;  %s291_s29 = scalar_lea.vmem [#allocation3], %s2089_s25 }
  0x13   : > { %s299_s14 = sshll.u32 %s291_s29, 4  ;;  %p2969_p13 = pnand %p2411_p10, %p2941_p5  ;;  %s2973_s14 = int_to_ptr.vmem [resolvable:$true] %s299_s14 }
  0x14   : > { %s2975_s17 = scalar_lea.sflag [#allocation4], %s287_s23  ;;  %s2739_s26 = scalar_lea.hbm %s2965_s28, 2048 }
  0x15   : > { %p2740_p0 = scmp.ne.s32.totalorder %s2965_s28, %s2739_s26  ;;  %p2741_p1 = pneg %p2969_p13 }
  0x16   : > { %s2744_s25 = scalar_lea.hbm %s3713_s0, 4096  ;;  %p2745_p4 = scmp.lt.u32.totalorder %s2965_s28, %s3713_s0 }
  0x17   : > { %p2742_p2 = pnand %p2741_p1, %p2740_p0  ;;  %p2746_p5 = scmp.lt.u32.totalorder %s2744_s25, %s2739_s26 }
  0x18   : > { %p2748_p8 = scmp.lt.u32.totalorder %s2739_s26, %s2965_s28 }
  0x19   : > { %p2743_p3 = pneg %p2742_p2  ;;  %p2747_p7 = por %p2746_p5, %p2745_p4 }
  0x1b   : > { %p2749_p10 = por %p2748_p8, %p2747_p7 }
  0x1d   : > { %p2750_p9 = pnand %p2749_p10, %p2743_p3 }
  0x1f   : > { %2753 = shalt.err (!%p2750_p9)
}
  0x20   : > { %s2754_s23 = scalar_lea.vmem %s2973_s14, 2048  ;;  %s2837_s24 = smov [#allocation3]  }
  0x21   : > { %p2755_p0 = scmp.ne.s32.totalorder %s2973_s14, %s2754_s23  ;;  %s2759_s19 = sshll.u32 %s2837_s24, 4  ;;  %s2760_s19 = int_to_ptr.vmem [resolvable:$false] %s2759_s19 }
  0x22   : > { %s2761_s27 = scalar_lea.vmem %s2760_s19, 4096  ;;  %p2762_p11 = scmp.lt.s32.totalorder %s2973_s14, %s2760_s19 }
  0x23   : > { %p2757_p2 = pnand %p2755_p0, %p2741_p1  ;;  %p2763_p4 = scmp.lt.s32.totalorder %s2761_s27, %s2754_s23 }
  0x25   : > { %p2758_p12 = pneg %p2757_p2  ;;  %p2764_p5 = por %p2763_p4, %p2762_p11 }
  0x27   : > { %p2765_p7 = pnand %p2764_p5, %p2758_p12 }
  0x29   : > { %2768 = shalt.err (!%p2765_p7)
}
  0x2a   : > { %s2838_s26 = smov 128   ;;  %s2839_s25 = smov 8  }
  0x2b   : > { %2406 = dma.hbm_to_vmem [thread:$0]  (!%p2969_p13), %s2965_s28, 2048, %s2973_s14, %s2975_s17, %s2838_s26, %s2838_s26, %s2839_s25  }
  0x2c   : > { %p2093_p9 = scmp.ge.s32.totalorder %s2835_s12, 1  ;;  %p307_p1 = scmp.lt.s32.totalorder %s2835_s12, 3 }
  0x2e   : > { %p308_p3 = pnand %p2093_p9, %p307_p1 }
  0x2f   : > { %s3006_s29 = sand.u32 (!%p308_p3), 1, %s2827_s10  }
  0x30   : > { %311 = sbr.rel (%p308_p3) target bundleno = 1004 (0x3ec), region = 56  ;;  %s2094_s23 = sshll.u32 (!%p308_p3), %s3006_s29, 7 }
  0x31   : > { %s314_s24 = scalar_lea.sflag (!%p308_p3), [#allocation4], %s3006_s29  ;;  %s3012_s19 = scalar_lea.vmem (!%p308_p3), [#allocation3], %s2094_s23 }
  0x37   : > { %2814 = dma.done.wait (%p2945_p6), %s314_s24, 2048  }
  0x38   : > { %2816 = vsyncadd (%p2945_p6), %s314_s24, 4294965248  ;;  %vm379_vm0 = vcmask 130048   ;;  %v370_v0 = vld [vmem:[%s3714_s1] sm:$0xff]  ;;  %v371_v1 = vld [vmem:[%s3714_s1 + $0x8] sm:$0xff]  ;;  %vm600_vm1 = vcmask 122880   ;;  %v2840_v19 = vmov 0.0  }
  0x39   : > { %v354_v2 = vld [vmem:[%s3012_s19] sm:$0xff]  ;;  %v2312_v3 = vpack.c.bf16 %v371_v1, %v370_v0  ;;  %v355_v4 = vld [vmem:[%s3012_s19 + $0x8] sm:$0xff]  ;;  %v356_v5 = vld [vmem:[%s3012_s19 + $0x10] sm:$0xff]  ;;  %618 = vst.msk [vmem:[#allocation2 + $0x29] sm:$0x1] %vm600_vm1, %v2840_v19  ;;  %vm590_vm2 = vcmask 123904  }
  0x3a   : > { %2232 = vmatprep.mubr.msk.f32.mxu0 %vm379_vm0, %v354_v2  ;;  %v357_v6 = vld [vmem:[%s3012_s19 + $0x18] sm:$0xff]  ;;  %v358_v7 = vld [vmem:[%s3012_s19 + $0x20] sm:$0xff]  ;;  %v359_v8 = vld [vmem:[%s3012_s19 + $0x28] sm:$0xff]  ;;  %589 = vst.msk [vmem:[#allocation2] sm:$0xff] %vm379_vm0, %v2840_v19  ;;  %v2841_v22 = vmov 0.0|0.0   ;;  %s2842_s26 = smov 48  }
  0x3b   : > { %2313 = vmatprep.subr.bf16.mxu0 %v2312_v3  ;;  %v360_v9 = vld [vmem:[%s3012_s19 + $0x30] sm:$0xff]  ;;  %v361_v10 = vld [vmem:[%s3012_s19 + $0x38] sm:$0xff]  ;;  %v362_v11 = vld [vmem:[%s3012_s19 + $0x40] sm:$0xff]  ;;  %592 = vst.msk [vmem:[#allocation2 + $0xa0] sm:$0xff] %vm379_vm0, %v2840_v19  ;;  %2316 = vmatprep.subr.bf16.mxu1 %v2841_v22  ;;  %s2843_s25 = smov 16   ;;  %s2844_s24 = smov 64  }
  0x3c   : > { %2315 = vmatpush3.bf16.msra.mxu0 %v2312_v3  ;;  %v363_v12 = vld [vmem:[%s3012_s19 + $0x48] sm:$0xff]  ;;  %v364_v13 = vld [vmem:[%s3012_s19 + $0x50] sm:$0xff]  ;;  %v365_v14 = vld [vmem:[%s3012_s19 + $0x58] sm:$0xff]  ;;  %595 = vst.msk [vmem:[#allocation2 + $0x90] sm:$0xff] %vm379_vm0, %v2840_v19  ;;  %s2845_s28 = smov 32   ;;  %s2846_s14 = smov 96  }
  0x3d   : > { %v366_v15 = vld [vmem:[%s3012_s19 + $0x60] sm:$0xff]  ;;  %v367_v16 = vld [vmem:[%s3012_s19 + $0x68] sm:$0xff]  ;;  %v368_v17 = vld [vmem:[%s3012_s19 + $0x70] sm:$0xff]  ;;  %597 = vst.msk [vmem:[#allocation2 + $0x130] sm:$0xff] %vm379_vm0, %v2840_v19  ;;  %s2847_s16 = smov 80   ;;  %s2848_s17 = smov 112  }
  0x3e   : > { %v369_v18 = vld [vmem:[%s3012_s19 + $0x78] sm:$0xff]  ;;  %601 = vst.msk [vmem:[#allocation2 + $0x10] sm:$0x1] %vm600_vm1, %v2840_v19  ;;  %602 = vst.msk [vmem:[#allocation2 + $0x20] sm:$0x1] %vm600_vm1, %v2840_v19  ;;  %v1360_v20 = vld [vmem:[%s3716_s3] sm:$0xff] }
  0x3f   : > { %2233 = vmatmul.mubr.msk.f32.vlgmr.msra.gmra.mrb[0].mxu0 %vm379_vm0, %v355_v4  ;;  %603 = vst.msk [vmem:[#allocation2 + $0x30] sm:$0x1] %vm600_vm1, %v2840_v19  ;;  %604 = vst.msk [vmem:[#allocation2 + $0x40] sm:$0x1] %vm600_vm1, %v2840_v19  ;;  %v1361_v21 = vld [vmem:[%s3716_s3 + $0x8] sm:$0xff]  ;;  %v1362_v24 = vld [vmem:[%s3716_s3 + $0x10] sm:$0xff] }
  0x40   : > { %2235 = vmatprep.mubr.msk.f32.mxu0 %vm379_vm0, %v356_v5  ;;  %605 = vst.msk [vmem:[#allocation2 + $0x50] sm:$0x1] %vm600_vm1, %v2840_v19  ;;  %606 = vst.msk [vmem:[#allocation2 + $0x60] sm:$0x1] %vm600_vm1, %v2840_v19  ;;  %v2317_v23 = vpack.c.bf16 %v1361_v21, %v1360_v20  ;;  %v1363_v25 = vld [vmem:[%s3716_s3 + $0x18] sm:$0xff]  ;;  %v1364_v27 = vld [vmem:[%s3716_s3 + $0x20] sm:$0xff] }
  0x41   : > { %607 = vst.msk [vmem:[#allocation2 + $0x70] sm:$0x1] %vm600_vm1, %v2840_v19  ;;  %608 = vst.msk [vmem:[#allocation2 + $0x80] sm:$0x1] %vm600_vm1, %v2840_v19  ;;  %v2320_v26 = vpack.c.bf16 %v1363_v25, %v1362_v24  ;;  %v1365_v28 = vld [vmem:[%s3716_s3 + $0x28] sm:$0xff]  ;;  %v1366_v30 = vld [vmem:[%s3716_s3 + $0x30] sm:$0xff] }
  0x42   : > { %609 = vst.msk [vmem:[#allocation2 + $0xb0] sm:$0x1] %vm600_vm1, %v2840_v19  ;;  %610 = vst.msk [vmem:[#allocation2 + $0xc0] sm:$0x1] %vm600_vm1, %v2840_v19  ;;  %2318 = vmatpush1.bf16.msra.mxu1 %v2317_v23  ;;  %v2323_v29 = vpack.c.bf16 %v1365_v28, %v1364_v27  ;;  %v1367_v31 = vld [vmem:[%s3716_s3 + $0x38] sm:$0xff]  ;;  %v1368_v33 = vld [vmem:[%s3716_s3 + $0x40] sm:$0xff] }
  0x43   : > { %2236 = vmatmul.mubr.msk.f32.gmra.mrb[2].mxu0 %vm379_vm0, %v357_v6  ;;  %611 = vst.msk [vmem:[#allocation2 + $0xd0] sm:$0x1] %vm600_vm1, %v2840_v19  ;;  %612 = vst.msk [vmem:[#allocation2 + $0xe0] sm:$0x1] %vm600_vm1, %v2840_v19  ;;  %2319 = vmatprep.subr.bf16.mxu1 %v2841_v22  ;;  %v2326_v32 = vpack.c.bf16 %v1367_v31, %v1366_v30  ;;  %v1369_v34 = vld [vmem:[%s3716_s3 + $0x48] sm:$0xff]  ;;  %v1370_v40 = vld [vmem:[%s3716_s3 + $0x50] sm:$0xff] }
  0x44   : > { %2238 = vmatprep.mubr.msk.f32.mxu0 %vm379_vm0, %v358_v7  ;;  %613 = vst.msk [vmem:[#allocation2 + $0xf0] sm:$0x1] %vm600_vm1, %v2840_v19  ;;  %614 = vst.msk [vmem:[#allocation2 + $0x100] sm:$0x1] %vm600_vm1, %v2840_v19  ;;  %v2329_v35 = vpack.c.bf16 %v1369_v34, %v1368_v33  ;;  %v3130_v36 = vld [vmem:[%s3715_s2] ss:$0 sm:$0xff] }
  0x45   : > { %615 = vst.msk [vmem:[#allocation2 + $0x110] sm:$0x1] %vm600_vm1, %v2840_v19  ;;  %616 = vst.msk [vmem:[#allocation2 + $0x120] sm:$0x1] %vm600_vm1, %v2840_v19  ;;  %v1371_v41 = vld [vmem:[%s3716_s3 + $0x58] sm:$0xff]  ;;  %v1372_v49 = vld [vmem:[%s3716_s3 + $0x60] sm:$0xff] }
  0x46   : > { %617 = vst.msk [vmem:[#allocation2 + $0x19] sm:$0x1] %vm600_vm1, %v2840_v19  ;;  %619 = vst.msk [vmem:[#allocation2 + $0x39] sm:$0x1] %vm600_vm1, %v2840_v19  ;;  %2321 = vmatpush1.bf16.msra.mxu1 %v2320_v26  ;;  %v2332_v43 = vpack.c.bf16 %v1371_v41, %v1370_v40  ;;  %v1373_v50 = vld [vmem:[%s3716_s3 + $0x68] sm:$0xff]  ;;  %v1374_v58 = vld [vmem:[%s3716_s3 + $0x70] sm:$0xff] }
  0x47   : > { %2239 = vmatmul.mubr.msk.f32.gmra.mrb[4].mxu0 %vm379_vm0, %v359_v8  ;;  %620 = vst.msk [vmem:[#allocation2 + $0x49] sm:$0x1] %vm600_vm1, %v2840_v19  ;;  %621 = vst.msk [vmem:[#allocation2 + $0x59] sm:$0x1] %vm600_vm1, %v2840_v19  ;;  %2322 = vmatprep.subr.bf16.mxu1 %v2841_v22  ;;  %v2335_v52 = vpack.c.bf16 %v1373_v50, %v1372_v49  ;;  %v1375_v59 = vld [vmem:[%s3716_s3 + $0x78] sm:$0xff]  ;;  %vm1258_vm3 = vcmask 261120  }
  0x48   : > { %2241 = vmatprep.mubr.msk.f32.mxu0 %vm379_vm0, %v360_v9  ;;  %622 = vst.msk [vmem:[#allocation2 + $0x69] sm:$0x1] %vm600_vm1, %v2840_v19  ;;  %623 = vst.msk [vmem:[#allocation2 + $0x79] sm:$0x1] %vm600_vm1, %v2840_v19  ;;  %v2338_v61 = vpack.c.bf16 %v1375_v59, %v1374_v58  ;;  %vm1275_vm4 = vcmask 392192   ;;  %vm1292_vm5 = vcmask 523264  }
  0x49   : > { %624 = vst.msk [vmem:[#allocation2 + $0x89] sm:$0x1] %vm600_vm1, %v2840_v19  ;;  %625 = vst.msk [vmem:[#allocation2 + $0xb9] sm:$0x1] %vm600_vm1, %v2840_v19  ;;  %vm1309_vm6 = vcmask 654336   ;;  %vm1326_vm7 = vcmask 785408  }
  0x4a   : > { %626 = vst.msk [vmem:[#allocation2 + $0xc9] sm:$0x1] %vm600_vm1, %v2840_v19  ;;  %627 = vst.msk [vmem:[#allocation2 + $0xd9] sm:$0x1] %vm600_vm1, %v2840_v19  ;;  %2324 = vmatpush1.bf16.msra.mxu1 %v2323_v29  ;;  %vm1343_vm8 = vcmask 916480   ;;  %p3729_p11 = scmp.ne.s32.totalorder %s3726_s21, 0 }
  0x4b   : > { %2242 = vmatmul.mubr.msk.f32.gmra.mrb[6].mxu0 %vm379_vm0, %v361_v10  ;;  %628 = vst.msk [vmem:[#allocation2 + $0xe9] sm:$0x1] %vm600_vm1, %v2840_v19  ;;  %629 = vst.msk [vmem:[#allocation2 + $0xf9] sm:$0x1] %vm600_vm1, %v2840_v19  ;;  %2325 = vmatprep.subr.bf16.mxu1 %v2841_v22  ;;  %v1376_v10 = vld [vmem:[%s3716_s3 + $0x80] sm:$0xff]  ;;  %s2849_s27 = smov [#allocation6]  }
  0x4c   : > { %2244 = vmatprep.mubr.msk.f32.mxu0 %vm379_vm0, %v362_v11  ;;  %630 = vst.msk [vmem:[#allocation2 + $0x109] sm:$0x1] %vm600_vm1, %v2840_v19  ;;  %631 = vst.msk [vmem:[#allocation2 + $0x119] sm:$0x1] %vm600_vm1, %v2840_v19  ;;  %v1377_v11 = vld [vmem:[%s3716_s3 + $0x88] sm:$0xff] }
  0x4d   : > { %632 = vst.msk [vmem:[#allocation2 + $0x129] sm:$0x1] %vm600_vm1, %v2840_v19 }
  0x4e   : > { %591 = vst.msk [vmem:[#allocation2 + $0x8] sm:$0x3] %vm590_vm2, %v2840_v19  ;;  %593 = vst.msk [vmem:[#allocation2 + $0xa8] sm:$0x3] %vm590_vm2, %v2840_v19  ;;  %2327 = vmatpush1.bf16.msra.mxu1 %v2326_v32 }
  0x4f   : > { %2245 = vmatmul.mubr.msk.f32.gmra.mrb[8].mxu0 %vm379_vm0, %v363_v12  ;;  %596 = vst.msk [vmem:[#allocation2 + $0x98] sm:$0x3] %vm590_vm2, %v2840_v19  ;;  %598 = vst.msk [vmem:[#allocation2 + $0x138] sm:$0x3] %vm590_vm2, %v2840_v19  ;;  %2328 = vmatprep.subr.bf16.mxu1 %v2841_v22 }
  0x50   : > { %2247 = vmatprep.mubr.msk.f32.mxu0 %vm379_vm0, %v364_v13 }
  0x52   : > { %2330 = vmatpush1.bf16.msra.mxu1 %v2329_v35 }
  0x53   : > { %2248 = vmatmul.mubr.msk.f32.gmra.mrb[10].mxu0 %vm379_vm0, %v365_v14  ;;  %2331 = vmatprep.subr.bf16.mxu1 %v2841_v22 }
  0x54   : > { %2250 = vmatprep.mubr.msk.f32.mxu0 %vm379_vm0, %v366_v15 }
  0x55   : > { %v665_v63 = vld [vmem:[#allocation2 + $0x1] sm:$0xff] }
  0x56   : > { %2333 = vmatpush1.bf16.msra.mxu1 %v2332_v43  ;;  %v681_v13 = vld [vmem:[#allocation2 + $0x2] sm:$0xff] }
  0x57   : > { %2251 = vmatmul.mubr.msk.f32.gmra.mrb[12].mxu0 %vm379_vm0, %v367_v16  ;;  %2334 = vmatprep.subr.bf16.mxu1 %v2841_v22 }
  0x58   : > { %2253 = vmatprep.mubr.msk.f32.mxu0 %vm379_vm0, %v368_v17  ;;  %v2341_v17 = vpack.c.bf16 %v1377_v11, %v1376_v10  ;;  %v753_v11 = vld [vmem:[#allocation2 + $0x90] sm:$0xff] }
  0x5a   : > { %2336 = vmatpush1.bf16.msra.mxu1 %v2335_v52 }
  0x5b   : > { %2254 = vmatmul.mubr.msk.f32.gmra.mrb[14].mxu0 %vm379_vm0, %v369_v18  ;;  %2337 = vmatprep.subr.bf16.mxu1 %v2841_v22 }
  0x5e   : > { %2339 = vmatpush1.bf16.msra.mxu1 %v2338_v61 }
  0x5f   : > { %2340 = vmatprep.subr.bf16.mxu1 %v2841_v22 }
  0x62   : > { %2342 = vmatpush1.bf16.msra.mxu1 %v2341_v17 }
 0x112   : > { %v2234_v37 = vpop.f32.mrb[0].mxu0 }
 0x113   : > { %v500_v38 = vadd.f32 %v2234_v37, %v3130_v36  ;;  %v494_v39 = vpop.f32.mrb[1].mxu0 }
 0x114   : > { %v495_v42 = vadd.f32 %v3130_v36, %v494_v39 }
 0x115   : > { %v574_v44 = vmax.f32 %v500_v38, 0.0 }
 0x116   : > { %v573_v45 = vmax.f32 %v495_v42, 0.0  ;;  %v2237_v46 = vpop.f32.mrb[2].mxu0 }
 0x117   : > { %634 = vst.msk [vmem:[#allocation2 + $0x21] sm:$0xff] %vm379_vm0, %v574_v44  ;;  %v510_v47 = vadd.f32 %v2237_v46, %v3130_v36  ;;  %v504_v48 = vpop.f32.mrb[3].mxu0 }
 0x118   : > { %633 = vst.msk [vmem:[#allocation2 + $0x11] sm:$0xff] %vm379_vm0, %v573_v45  ;;  %v505_v51 = vadd.f32 %v3130_v36, %v504_v48 }
 0x119   : > { %v576_v53 = vmax.f32 %v510_v47, 0.0 }
 0x11a   : > { %v575_v54 = vmax.f32 %v505_v51, 0.0  ;;  %v2240_v55 = vpop.f32.mrb[4].mxu0 }
 0x11b   : > { %636 = vst.msk [vmem:[#allocation2 + $0x41] sm:$0xff] %vm379_vm0, %v576_v53  ;;  %v520_v56 = vadd.f32 %v2240_v55, %v3130_v36  ;;  %v514_v57 = vpop.f32.mrb[5].mxu0 }
 0x11c   : > { %635 = vst.msk [vmem:[#allocation2 + $0x31] sm:$0xff] %vm379_vm0, %v575_v54  ;;  %v515_v60 = vadd.f32 %v3130_v36, %v514_v57 }
 0x11d   : > { %v578_v62 = vmax.f32 %v520_v56, 0.0 }
 0x11e   : > { %v577_v0 = vmax.f32 %v515_v60, 0.0  ;;  %v3163_v1 = vld [vmem:[#allocation2 + $0x22] sm:$0xff]  ;;  %v2243_v3 = vpop.f32.mrb[6].mxu0 }
 0x11f   : > { %v3165_v2 = vld [vmem:[#allocation2 + $0x20] sm:$0xff]  ;;  %638 = vst.msk [vmem:[#allocation2 + $0x61] sm:$0xff] %vm379_vm0, %v578_v62  ;;  %2114 = vmatprep.mubr.msk.f32.mxu1 %vm379_vm0, %v3163_v1  ;;  %v3170_v4 = vld [vmem:[#allocation2 + $0x10] sm:$0xff]  ;;  %v530_v6 = vadd.f32 %v2243_v3, %v3130_v36  ;;  %v524_v7 = vpop.f32.mrb[7].mxu0 }
 0x120   : > { %v666_v5 = vld [vmem:[#allocation2 + $0x11] sm:$0xff]  ;;  %637 = vst.msk [vmem:[#allocation2 + $0x51] sm:$0xff] %vm379_vm0, %v577_v0  ;;  %v2468_v8 = vpack.i.bf16 %v3165_v2, %v3170_v4  ;;  %v714_v12 = vld [vmem:[#allocation2 + $0x21] sm:$0xff]  ;;  %v525_v16 = vadd.f32 %v3130_v36, %v524_v7 }
 0x121   : > { %v2458_v9 = vpack.i.bf16 %v666_v5, %v665_v63  ;;  %v682_v14 = vld [vmem:[#allocation2 + $0x12] sm:$0xff]  ;;  %v580_v15 = vmax.f32 %v530_v6, 0.0  ;;  %v2473_v22 = vpack.i.bf16 %v714_v12, %v666_v5 }
 0x122   : > { %2469 = vrot.lane.b32.xlu1 %v2468_v8, %s2842_s26  ;;  %v2246_v18 = vpop.f32.mrb[8].mxu0  ;;  %v579_v19 = vmax.f32 %v525_v16, 0.0  ;;  %v2463_v23 = vpack.i.bf16 %v682_v14, %v681_v13  ;;  %v2478_v32 = vpack.i.bf16 %v3163_v1, %v682_v14  ;;  %v3206_v43 = vld [vmem:[#allocation2 + $0x40] sm:$0xff]  ;;  %v769_v5 = vld [vmem:[#allocation2 + $0x91] sm:$0xff] }
 0x123   : > { %2459 = vrot.lane.b32.xlu0 %v2458_v9, %s2843_s25  ;;  %640 = vst.msk [vmem:[#allocation2 + $0x81] sm:$0xff] %vm379_vm0, %v580_v15  ;;  %v540_v20 = vadd.f32 %v2246_v18, %v3130_v36  ;;  %v534_v21 = vpop.f32.mrb[9].mxu0  ;;  %v3189_v24 = vld [vmem:[#allocation2 + $0x30] sm:$0xff]  ;;  %v3221_v53 = vld [vmem:[#allocation2 + $0x42] sm:$0xff] }
 0x124   : > { %639 = vst.msk [vmem:[#allocation2 + $0x71] sm:$0xff] %vm379_vm0, %v579_v19  ;;  %v535_v26 = vadd.f32 %v3130_v36, %v534_v21  ;;  %v2483_v31 = vpack.i.bf16 %v3189_v24, %v3165_v2  ;;  %v668_v33 = vld [vmem:[#allocation2 + $0x31] sm:$0xff]  ;;  %v2503_v50 = vpack.i.bf16 %v3206_v43, %v3189_v24  ;;  %v716_v54 = vld [vmem:[#allocation2 + $0x41] sm:$0xff] }
 0x125   : > { %v582_v25 = vmax.f32 %v540_v20, 0.0  ;;  %v2493_v41 = vpack.i.bf16 %v668_v33, %v714_v12  ;;  %v3208_v44 = vld [vmem:[#allocation2 + $0x32] sm:$0xff]  ;;  %v2508_v58 = vpack.i.bf16 %v716_v54, %v668_v33 }
 0x126   : > { %2474 = vrot.lane.b32.xlu1 %v2473_v22, %s2844_s24  ;;  %v2249_v27 = vpop.f32.mrb[10].mxu0  ;;  %v581_v28 = vmax.f32 %v535_v26, 0.0  ;;  %v2498_v51 = vpack.i.bf16 %v3208_v44, %v3163_v1  ;;  %v2513_v57 = vpack.i.bf16 %v3221_v53, %v3208_v44  ;;  %v718_v0 = vld [vmem:[#allocation2 + $0x61] sm:$0xff] }
 0x127   : > { %2464 = vrot.lane.b32.xlu0 %v2463_v23, %s2845_s28  ;;  %642 = vst.msk [vmem:[#allocation2 + $0xc1] sm:$0xff] %vm379_vm0, %v582_v25  ;;  %v550_v29 = vadd.f32 %v2249_v27, %v3130_v36  ;;  %v544_v30 = vpop.f32.mrb[11].mxu0  ;;  %v765_v59 = vld [vmem:[#allocation2 + $0x51] sm:$0xff]  ;;  %v3241_v1 = vld [vmem:[#allocation2 + $0x60] sm:$0xff] }
 0x128   : > { %641 = vst.msk [vmem:[#allocation2 + $0xb1] sm:$0xff] %vm379_vm0, %v581_v28  ;;  %v545_v35 = vadd.f32 %v3130_v36, %v544_v30  ;;  %v3229_v60 = vld [vmem:[#allocation2 + $0x50] sm:$0xff]  ;;  %v2543_v6 = vpack.i.bf16 %v718_v0, %v765_v59  ;;  %v3247_v8 = vld [vmem:[#allocation2 + $0x62] sm:$0xff] }
 0x129   : > { %v584_v34 = vmax.f32 %v550_v29, 0.0  ;;  %v2518_v61 = vpack.i.bf16 %v3229_v60, %v3206_v43  ;;  %v3235_v62 = vld [vmem:[#allocation2 + $0x52] sm:$0xff]  ;;  %v2538_v7 = vpack.i.bf16 %v3241_v1, %v3229_v60  ;;  %v689_v22 = vld [vmem:[#allocation2 + $0xa2] sm:$0xff] }
 0x12a   : > { %2484 = vrot.lane.b32.xlu1 %v2483_v31, %s2846_s14  ;;  %v2252_v37 = vpop.f32.mrb[12].mxu0  ;;  %v583_v38 = vmax.f32 %v545_v35, 0.0  ;;  %v2533_v63 = vpack.i.bf16 %v3235_v62, %v3221_v53  ;;  %v768_v3 = vld [vmem:[#allocation2 + $0x81] sm:$0xff]  ;;  %v2548_v12 = vpack.i.bf16 %v3247_v8, %v3235_v62 }
 0x12b   : > { %2479 = vrot.lane.b32.xlu0 %v2478_v32, %s2847_s16  ;;  %644 = vst.msk [vmem:[#allocation2 + $0xe1] sm:$0xff] %vm379_vm0, %v584_v34  ;;  %v560_v39 = vadd.f32 %v2252_v37, %v3130_v36  ;;  %v554_v40 = vpop.f32.mrb[13].mxu0  ;;  %v2558_v9 = vpack.i.bf16 %v769_v5, %v768_v3  ;;  %v752_v10 = vld [vmem:[#allocation2 + $0x80] sm:$0xff]  ;;  %v3253_v13 = vld [vmem:[#allocation2 + $0x70] sm:$0xff] }
 0x12c   : > { %v555_v42 = vadd.f32 %v3130_v36, %v554_v40  ;;  %643 = vst.msk [vmem:[#allocation2 + $0xd1] sm:$0xff] %vm379_vm0, %v583_v38  ;;  %v2553_v14 = vpack.i.bf16 %v753_v11, %v752_v10  ;;  %v2563_v15 = vpack.i.bf16 %v3253_v13, %v3241_v1  ;;  %v672_v16 = vld [vmem:[#allocation2 + $0x71] sm:$0xff]  ;;  %v2583_v19 = vpack.i.bf16 %v752_v10, %v3253_v13  ;;  %v3268_v21 = vld [vmem:[#allocation2 + $0x82] sm:$0xff] }
 0x12d   : > { %v586_v45 = vmax.f32 %v560_v39, 0.0  ;;  %v2573_v17 = vpack.i.bf16 %v672_v16, %v718_v0  ;;  %v3261_v18 = vld [vmem:[#allocation2 + $0x72] sm:$0xff]  ;;  %v673_v25 = vld [vmem:[#allocation2 + $0xa1] sm:$0xff]  ;;  %v2588_v28 = vpack.i.bf16 %v768_v3, %v672_v16 }
 0x12e   : > { %2494 = vrot.lane.b32.xlu1 %v2493_v41, %s2843_s25  ;;  %v585_v46 = vmax.f32 %v555_v42, 0.0  ;;  %v2255_v47 = vpop.f32.mrb[14].mxu0  ;;  %v2578_v20 = vpack.i.bf16 %v3261_v18, %v3247_v8  ;;  %v2593_v27 = vpack.i.bf16 %v3268_v21, %v3261_v18  ;;  %v722_v31 = vld [vmem:[#allocation2 + $0xc1] sm:$0xff] }
 0x12f   : > { %2489 = vrot.lane.b32.xlu0 %v2493_v41, %s2848_s17  ;;  %v570_v48 = vadd.f32 %v2255_v47, %v3130_v36  ;;  %v564_v49 = vpop.f32.mrb[15].mxu0  ;;  %646 = vst.msk [vmem:[#allocation2 + $0x101] sm:$0xff] %vm379_vm0, %v586_v45  ;;  %v690_v23 = vld [vmem:[#allocation2 + $0xb2] sm:$0xff]  ;;  %v3278_v33 = vld [vmem:[#allocation2 + $0xc0] sm:$0xff] }
 0x130   : > { %645 = vst.msk [vmem:[#allocation2 + $0xf1] sm:$0xff] %vm379_vm0, %v585_v46  ;;  %v565_v52 = vadd.f32 %v3130_v36, %v564_v49  ;;  %v2523_v36 = vpack.i.bf16 %v765_v59, %v716_v54  ;;  %v674_v26 = vld [vmem:[#allocation2 + $0xb1] sm:$0xff]  ;;  %v2603_v29 = vpack.i.bf16 %v690_v23, %v689_v22  ;;  %v3286_v38 = vld [vmem:[#allocation2 + $0xc2] sm:$0xff] }
 0x131   : > { %v588_v55 = vmax.f32 %v570_v48, 0.0  ;;  %v2598_v30 = vpack.i.bf16 %v674_v26, %v673_v25  ;;  %v3276_v32 = vld [vmem:[#allocation2 + $0xb0] sm:$0xff]  ;;  %v2613_v34 = vpack.i.bf16 %v722_v31, %v674_v26  ;;  %v2618_v40 = vpack.i.bf16 %v3286_v38, %v690_v23 }
 0x132   : > { %2504 = vrot.lane.b32.xlu1 %v2503_v50, %s2842_s26  ;;  %v587_v56 = vmax.f32 %v565_v52, 0.0  ;;  %v2608_v35 = vpack.i.bf16 %v3278_v33, %v3276_v32  ;;  %v3295_v45 = vld [vmem:[#allocation2 + $0xe0] sm:$0xff]  ;;  %v777_v22 = vld [vmem:[#allocation2 + $0x131] sm:$0xff] }
 0x133   : > { %2499 = vrot.lane.b32.xlu0 %v2498_v51, %s2845_s28  ;;  %648 = vst.msk [vmem:[#allocation2 + $0x121] sm:$0xff] %vm379_vm0, %v588_v55  ;;  %v3284_v37 = vld [vmem:[#allocation2 + $0xd0] sm:$0xff]  ;;  %v3305_v49 = vld [vmem:[#allocation2 + $0xe2] sm:$0xff] }
 0x134   : > { %647 = vst.msk [vmem:[#allocation2 + $0x111] sm:$0xff] %vm379_vm0, %v587_v56  ;;  %v2623_v39 = vpack.i.bf16 %v3284_v37, %v3278_v33  ;;  %v676_v41 = vld [vmem:[#allocation2 + $0xd1] sm:$0xff]  ;;  %v2643_v47 = vpack.i.bf16 %v3295_v45, %v3284_v37  ;;  %v724_v50 = vld [vmem:[#allocation2 + $0xe1] sm:$0xff] }
 0x135   : > { %v2633_v42 = vpack.i.bf16 %v676_v41, %v722_v31  ;;  %v3297_v46 = vld [vmem:[#allocation2 + $0xd2] sm:$0xff]  ;;  %v2648_v52 = vpack.i.bf16 %v724_v50, %v676_v41 }
 0x136   : > { %2514 = vrot.lane.b32.xlu1 %v2513_v57, %s2847_s16  ;;  %v2638_v48 = vpack.i.bf16 %v3297_v46, %v3286_v38  ;;  %v2653_v51 = vpack.i.bf16 %v3305_v49, %v3297_v46  ;;  %v3331_v5 = vld [vmem:[#allocation2 + $0x102] sm:$0xff] }
 0x137   : > { %2509 = vrot.lane.b32.xlu0 %v2508_v58, %s2844_s24  ;;  %v773_v54 = vld [vmem:[#allocation2 + $0xf1] sm:$0xff] }
 0x138   : > { %v3311_v55 = vld [vmem:[#allocation2 + $0xf0] sm:$0xff]  ;;  %v2663_v56 = vpack.i.bf16 %v773_v54, %v724_v50 }
 0x139   : > { %v2658_v57 = vpack.i.bf16 %v3311_v55, %v3295_v45  ;;  %v3317_v58 = vld [vmem:[#allocation2 + $0xf2] sm:$0xff] }
 0x13a   : > { %2524 = vrot.lane.b32.xlu1 %v2523_v36, %s2848_s17  ;;  %v2673_v59 = vpack.i.bf16 %v3317_v58, %v3305_v49  ;;  %v760_v11 = vld [vmem:[#allocation2 + $0x120] sm:$0xff] }
 0x13b   : > { %2519 = vrot.lane.b32.xlu0 %v2518_v61, %s2846_s14  ;;  %v3323_v61 = vld [vmem:[#allocation2 + $0x100] sm:$0xff]  ;;  %v3329_v3 = vld [vmem:[#allocation2 + $0x110] sm:$0xff] }
 0x13c   : > { %v2678_v0 = vpack.i.bf16 %v3323_v61, %v3311_v55  ;;  %v776_v16 = vld [vmem:[#allocation2 + $0x121] sm:$0xff] }
 0x13e   : > { %2534 = vrot.lane.b32.xlu1 %v2533_v63, %s2845_s28 }
 0x13f   : > { %2529 = vrot.lane.b32.xlu0 %v2523_v36, %s2843_s25  ;;  %v726_v36 = vld [vmem:[#allocation2 + $0x101] sm:$0xff] }
 0x140   : > { %v2683_v63 = vpack.i.bf16 %v726_v36, %v773_v54 }
 0x142   : > { %2544 = vrot.lane.b32.xlu1 %v2543_v6, %s2844_s24  ;;  %v2693_v6 = vpack.i.bf16 %v3329_v3, %v3323_v61 }
 0x143   : > { %2539 = vrot.lane.b32.xlu0 %v2538_v7, %s2842_s26  ;;  %v2688_v7 = vpack.i.bf16 %v3331_v5, %v3317_v58 }
 0x146   : > { %2559 = vrot.lane.b32.xlu1 %v2558_v9, %s2848_s17  ;;  %v680_v9 = vld [vmem:[#allocation2 + $0x111] sm:$0xff] }
 0x147   : > { %2549 = vrot.lane.b32.xlu0 %v2548_v12, %s2847_s16  ;;  %v2703_v10 = vpack.i.bf16 %v680_v9, %v726_v36  ;;  %v2713_v12 = vpack.i.bf16 %v760_v11, %v3329_v3 }
 0x14a   : > { %2564 = vrot.lane.b32.xlu1 %v2563_v15, %s2846_s14 }
 0x14b   : > { %2554 = vrot.lane.b32.xlu0 %v2553_v14, %s2846_s14  ;;  %v3344_v14 = vld [vmem:[#allocation2 + $0x112] sm:$0xff] }
 0x14c   : > { %v2708_v15 = vpack.i.bf16 %v3344_v14, %v3331_v5 }
 0x14e   : > { %2574 = vrot.lane.b32.xlu1 %v2573_v17, %s2843_s25 }
 0x14f   : > { %2569 = vrot.lane.b32.xlu0 %v2573_v17, %s2848_s17  ;;  %v2718_v17 = vpack.i.bf16 %v776_v16, %v680_v9 }
 0x152   : > { %2584 = vrot.lane.b32.xlu1 %v2583_v19, %s2842_s26  ;;  %v761_v19 = vld [vmem:[#allocation2 + $0x130] sm:$0xff] }
 0x153   : > { %2579 = vrot.lane.b32.xlu0 %v2578_v20, %s2845_s28  ;;  %v3355_v20 = vld [vmem:[#allocation2 + $0x122] sm:$0xff] }
 0x156   : > { %2594 = vrot.lane.b32.xlu1 %v2593_v27, %s2847_s16 }
 0x157   : > { %2589 = vrot.lane.b32.xlu0 %v2588_v28, %s2844_s24  ;;  %v649_v28 = vld [vmem:[#allocation2] sm:$0xff] }
 0x15a   : > { %2604 = vrot.lane.b32.xlu1 %v2603_v29, %s2845_s28 }
 0x15b   : > { %2599 = vrot.lane.b32.xlu0 %v2598_v30, %s2843_s25 }
 0x15e   : > { %2614 = vrot.lane.b32.xlu1 %v2613_v34, %s2844_s24 }
 0x15f   : > { %2609 = vrot.lane.b32.xlu0 %v2608_v35, %s2842_s26 }
 0x162   : > { %2624 = vrot.lane.b32.xlu1 %v2623_v39, %s2846_s14 }
 0x163   : > { %2619 = vrot.lane.b32.xlu0 %v2618_v40, %s2847_s16 }
 0x166   : > { %2634 = vrot.lane.b32.xlu1 %v2633_v42, %s2843_s25 }
 0x167   : > { %2629 = vrot.lane.b32.xlu0 %v2633_v42, %s2848_s17 }
 0x16a   : > { %2644 = vrot.lane.b32.xlu1 %v2643_v47, %s2842_s26 }
 0x16b   : > { %2639 = vrot.lane.b32.xlu0 %v2638_v48, %s2845_s28 }
 0x16e   : > { %2654 = vrot.lane.b32.xlu1 %v2653_v51, %s2847_s16 }
 0x16f   : > { %2649 = vrot.lane.b32.xlu0 %v2648_v52, %s2844_s24 }
 0x172   : > { %2664 = vrot.lane.b32.xlu1 %v2663_v56, %s2848_s17 }
 0x173   : > { %2659 = vrot.lane.b32.xlu0 %v2658_v57, %s2846_s14 }
 0x176   : > { %2674 = vrot.lane.b32.xlu1 %v2673_v59, %s2845_s28 }
 0x177   : > { %2669 = vrot.lane.b32.xlu0 %v2663_v56, %s2843_s25 }
 0x17a   : > { %2684 = vrot.lane.b32.xlu1 %v2683_v63, %s2844_s24 }
 0x17b   : > { %2679 = vrot.lane.b32.xlu0 %v2678_v0, %s2842_s26 }
 0x17e   : > { %2694 = vrot.lane.b32.xlu1 %v2693_v6, %s2846_s14 }
 0x17f   : > { %2689 = vrot.lane.b32.xlu0 %v2688_v7, %s2847_s16 }
 0x182   : > { %2704 = vrot.lane.b32.xlu1 %v2703_v10, %s2843_s25 }
 0x183   : > { %1158 = vrot.lane.b32.xlu0 %v760_v11, %s2846_s14 }
 0x186   : > { %2714 = vrot.lane.b32.xlu1 %v2713_v12, %s2842_s26  ;;  %s2773_s26 = sshll.u32 %s2849_s27, 4  ;;  %s2774_s26 = int_to_ptr.vmem [resolvable:$false] %s2773_s26 }
 0x187   : > { %2699 = vrot.lane.b32.xlu0 %v2703_v10, %s2848_s17  ;;  %s2775_s25 = scalar_lea.vmem %s2774_s26, 4096 }
 0x18a   : > { %1094 = vrot.lane.b32.xlu1 %v3344_v14, %s2847_s16 }
 0x18b   : > { %2709 = vrot.lane.b32.xlu0 %v2708_v15, %s2845_s28 }
 0x18e   : > { %1222 = vrot.lane.b32.xlu1 %v776_v16, %s2848_s17 }
 0x18f   : > { %2719 = vrot.lane.b32.xlu0 %v2718_v17, %s2844_s24 }
 0x192   : > { %1160 = vrot.lane.b32.xlu1 %v761_v19, %s2846_s14 }
 0x193   : > { %1096 = vrot.lane.b32.xlu0 %v3355_v20, %s2847_s16 }
 0x194   : > { %v2470_v23 = vpop.permute.xlu1 %2469 }
 0x195   : > { %v2460_v25 = vpop.permute.xlu0 %2459  ;;  %v2471_v35 = vunpack.i.l.bf16 %v2470_v23  ;;  %v2472_v41 = vunpack.i.h.bf16 %v2470_v23 }
 0x196   : > { %v2462_v26 = vunpack.i.h.bf16 %v2460_v25  ;;  %v2461_v27 = vunpack.i.l.bf16 %v2460_v25 }
 0x197   : > { %1224 = vrot.lane.b32.xlu0 %v777_v22, %s2848_s17 }
 0x198   : > { %v2475_v29 = vpop.permute.xlu1 %2474  ;;  %v1242_v39 = vsel %vm379_vm0, %v649_v28, %v2461_v27  ;;  %v1243_v40 = vsel %vm379_vm0, %v3170_v4, %v2462_v26 }
 0x199   : > { %v2465_v30 = vpop.permute.xlu0 %2464  ;;  %v2476_v48 = vunpack.i.l.bf16 %v2475_v29  ;;  %v2477_v57 = vunpack.i.h.bf16 %v2475_v29 }
 0x19a   : > { %v2467_v31 = vunpack.i.h.bf16 %v2465_v30  ;;  %v2466_v34 = vunpack.i.l.bf16 %v2465_v30 }
 0x19c   : > { %v1259_v42 = vsel %vm1258_vm3, %v1242_v39, %v2466_v34  ;;  %v1260_v47 = vsel %vm1258_vm3, %v1243_v40, %v2467_v31  ;;  %v2485_v51 = vpop.permute.xlu1 %2484 }
 0x19d   : > { %v1276_v50 = vsel %vm1275_vm4, %v1259_v42, %v2471_v35  ;;  %v2480_v52 = vpop.permute.xlu0 %2479  ;;  %v1277_v54 = vsel %vm1275_vm4, %v1260_v47, %v2472_v41  ;;  %v2486_v59 = vunpack.i.l.bf16 %v2485_v51  ;;  %v2487_v10 = vunpack.i.h.bf16 %v2485_v51 }
 0x19e   : > { %v2481_v56 = vunpack.i.l.bf16 %v2480_v52  ;;  %v1293_v36 = vsel %vm1292_vm5, %v1276_v50, %v2476_v48  ;;  %v2482_v4 = vunpack.i.h.bf16 %v2480_v52  ;;  %v1294_v7 = vsel %vm1292_vm5, %v1277_v54, %v2477_v57 }
 0x1a0   : > { %v1310_v63 = vsel %vm1309_vm6, %v1293_v36, %v2481_v56  ;;  %v2495_v0 = vpop.permute.xlu1 %2494  ;;  %v1311_v17 = vsel %vm1309_vm6, %v1294_v7, %v2482_v4 }
 0x1a1   : > { %v2490_v6 = vpop.permute.xlu0 %2489  ;;  %v2496_v11 = vunpack.i.l.bf16 %v2495_v0  ;;  %v1327_v12 = vsel %vm1326_vm7, %v1310_v63, %v2486_v59  ;;  %v2497_v19 = vunpack.i.h.bf16 %v2495_v0  ;;  %v1328_v29 = vsel %vm1326_vm7, %v1311_v17, %v2487_v10 }
 0x1a2   : > { %v2491_v9 = vunpack.i.l.bf16 %v2490_v6  ;;  %v2492_v15 = vunpack.i.h.bf16 %v2490_v6 }
 0x1a3   : > { %v1244_v27 = vsel %vm379_vm0, %v3165_v2, %v2496_v11  ;;  %v1245_v34 = vsel %vm379_vm0, %v3189_v24, %v2497_v19 }
 0x1a4   : > { %v1344_v16 = vsel %vm1343_vm8, %v1327_v12, %v2491_v9  ;;  %v2505_v22 = vpop.permute.xlu1 %2504  ;;  %v1345_v31 = vsel %vm1343_vm8, %v1328_v29, %v2492_v15 }
 0x1a5   : > { %v2500_v23 = vpop.permute.xlu0 %2499  ;;  %1498 = vmatmul.mubr.f32.vlgmr.msra.gmra.mrb[0].mxu1 %v1344_v16  ;;  %v2506_v28 = vunpack.i.l.bf16 %v2505_v22  ;;  %v2507_v35 = vunpack.i.h.bf16 %v2505_v22 }
 0x1a6   : > { %v2502_v25 = vunpack.i.h.bf16 %v2500_v23  ;;  %v2501_v26 = vunpack.i.l.bf16 %v2500_v23  ;;  %2115 = vmatprep.mubr.msk.f32.mxu1 %vm379_vm0, %v3208_v44 }
 0x1a8   : > { %v1261_v30 = vsel %vm1258_vm3, %v1244_v27, %v2501_v26  ;;  %v2515_v39 = vpop.permute.xlu1 %2514  ;;  %v1262_v41 = vsel %vm1258_vm3, %v1245_v34, %v2502_v25 }
 0x1a9   : > { %v2510_v40 = vpop.permute.xlu0 %2509  ;;  %1503 = vmatmul.mubr.f32.gmra.mrb[2].mxu1 %v1345_v31  ;;  %v2516_v2 = vunpack.i.l.bf16 %v2515_v39  ;;  %v1278_v47 = vsel %vm1275_vm4, %v1261_v30, %v2506_v28  ;;  %v2517_v50 = vunpack.i.h.bf16 %v2515_v39  ;;  %v1279_v51 = vsel %vm1275_vm4, %v1262_v41, %v2507_v35 }
 0x1aa   : > { %v2512_v44 = vunpack.i.h.bf16 %v2510_v40  ;;  %v2511_v42 = vunpack.i.l.bf16 %v2510_v40  ;;  %2116 = vmatprep.mubr.msk.f32.mxu1 %vm379_vm0, %v3221_v53 }
 0x1ac   : > { %v1295_v48 = vsel %vm1292_vm5, %v1278_v47, %v2511_v42  ;;  %v2525_v24 = vpop.permute.xlu1 %2524  ;;  %v1296_v54 = vsel %vm1292_vm5, %v1279_v51, %v2512_v44 }
 0x1ad   : > { %v2520_v52 = vpop.permute.xlu0 %2519  ;;  %v2526_v56 = vunpack.i.l.bf16 %v2525_v24  ;;  %v1312_v36 = vsel %vm1309_vm6, %v1295_v48, %v2516_v2  ;;  %v2527_v53 = vunpack.i.h.bf16 %v2525_v24  ;;  %v1313_v7 = vsel %vm1309_vm6, %v1296_v54, %v2517_v50 }
 0x1ae   : > { %v2522_v57 = vunpack.i.h.bf16 %v2520_v52  ;;  %v2521_v59 = vunpack.i.l.bf16 %v2520_v52 }
 0x1b0   : > { %v1329_v4 = vsel %vm1326_vm7, %v1312_v36, %v2521_v59  ;;  %v2535_v63 = vpop.permute.xlu1 %2534  ;;  %v1330_v9 = vsel %vm1326_vm7, %v1313_v7, %v2522_v57 }
 0x1b1   : > { %v2530_v0 = vpop.permute.xlu0 %2529  ;;  %v1346_v6 = vsel %vm1343_vm8, %v1329_v4, %v2526_v56  ;;  %v1347_v12 = vsel %vm1343_vm8, %v1330_v9, %v2527_v53  ;;  %v2536_v16 = vunpack.i.l.bf16 %v2535_v63  ;;  %v2537_v26 = vunpack.i.h.bf16 %v2535_v63 }
 0x1b2   : > { %1508 = vmatmul.mubr.f32.gmra.mrb[4].mxu1 %v1346_v6  ;;  %v2531_v15 = vunpack.i.l.bf16 %v2530_v0  ;;  %v2532_v17 = vunpack.i.h.bf16 %v2530_v0 }
 0x1b3   : > { %2117 = vmatprep.mubr.msk.f32.mxu1 %vm379_vm0, %v3235_v62 }
 0x1b4   : > { %v2545_v10 = vpop.permute.xlu1 %2544  ;;  %v1246_v23 = vsel %vm379_vm0, %v3206_v43, %v2531_v15  ;;  %v1247_v62 = vsel %vm379_vm0, %v3229_v60, %v2532_v17 }
 0x1b5   : > { %v2540_v11 = vpop.permute.xlu0 %2539  ;;  %v2546_v27 = vunpack.i.l.bf16 %v2545_v10  ;;  %v1263_v29 = vsel %vm1258_vm3, %v1246_v23, %v2536_v16  ;;  %v2547_v39 = vunpack.i.h.bf16 %v2545_v10  ;;  %v1264_v40 = vsel %vm1258_vm3, %v1247_v62, %v2537_v26 }
 0x1b6   : > { %1513 = vmatmul.mubr.f32.gmra.mrb[6].mxu1 %v1347_v12  ;;  %v2541_v25 = vunpack.i.l.bf16 %v2540_v11  ;;  %v2542_v28 = vunpack.i.h.bf16 %v2540_v11 }
 0x1b7   : > { %2118 = vmatprep.mubr.msk.f32.mxu1 %vm379_vm0, %v3247_v8 }
 0x1b8   : > { %v3400_v19 = vpop.permute.xlu1 %2559  ;;  %v1280_v8 = vsel %vm1275_vm4, %v1263_v29, %v2541_v25  ;;  %v1281_v43 = vsel %vm1275_vm4, %v1264_v40, %v2542_v28  ;;  %v657_v28 = vld [vmem:[#allocation2 + $0xa0] sm:$0xff] }
 0x1b9   : > { %v2550_v22 = vpop.permute.xlu0 %2549  ;;  %v1297_v60 = vsel %vm1292_vm5, %v1280_v8, %v2546_v27  ;;  %v1298_v56 = vsel %vm1292_vm5, %v1281_v43, %v2547_v39  ;;  %v2561_v8 = vunpack.i.l.bf16 %v3400_v19  ;;  %v785_v43 = vld [vmem:[#allocation2 + $0x92] sm:$0xff] }
 0x1ba   : > { %v2551_v34 = vunpack.i.l.bf16 %v2550_v22  ;;  %v2552_v41 = vunpack.i.h.bf16 %v2550_v22 }
 0x1bc   : > { %v2565_v30 = vpop.permute.xlu1 %2564  ;;  %v1314_v48 = vsel %vm1309_vm6, %v1297_v60, %v2551_v34  ;;  %v1315_v36 = vsel %vm1309_vm6, %v1298_v56, %v2552_v41 }
 0x1bd   : > { %v3407_v31 = vpop.permute.xlu0 %2554  ;;  %v2566_v35 = vunpack.i.l.bf16 %v2565_v30  ;;  %v2567_v2 = vunpack.i.h.bf16 %v2565_v30 }
 0x1be   : > { %v2556_v62 = vunpack.i.l.bf16 %v3407_v31 }
 0x1bf   : > { %v1331_v24 = vsel %vm1326_vm7, %v1314_v48, %v2566_v35  ;;  %v1332_v63 = vsel %vm1326_vm7, %v1315_v36, %v2567_v2  ;;  %v2557_v35 = vunpack.i.h.bf16 %v3407_v31  ;;  %v2562_v48 = vunpack.i.h.bf16 %v3400_v19 }
 0x1c0   : > { %v2575_v44 = vpop.permute.xlu1 %2574 }
 0x1c1   : > { %v2570_v42 = vpop.permute.xlu0 %2569  ;;  %v2577_v50 = vunpack.i.h.bf16 %v2575_v44  ;;  %v2576_v51 = vunpack.i.l.bf16 %v2575_v44 }
 0x1c2   : > { %v2571_v47 = vunpack.i.l.bf16 %v2570_v42  ;;  %v2572_v52 = vunpack.i.h.bf16 %v2570_v42 }
 0x1c3   : > { %v1249_v0 = vsel %vm379_vm0, %v3253_v13, %v2577_v50  ;;  %v1248_v6 = vsel %vm379_vm0, %v3241_v1, %v2576_v51 }
 0x1c4   : > { %v1348_v54 = vsel %vm1343_vm8, %v1331_v24, %v2571_v47  ;;  %v2585_v57 = vpop.permute.xlu1 %2584  ;;  %v1349_v12 = vsel %vm1343_vm8, %v1332_v63, %v2572_v52 }
 0x1c5   : > { %v2580_v59 = vpop.permute.xlu0 %2579  ;;  %1518 = vmatmul.mubr.f32.gmra.mrb[8].mxu1 %v1348_v54  ;;  %v2587_v7 = vunpack.i.h.bf16 %v2585_v57  ;;  %v2586_v9 = vunpack.i.l.bf16 %v2585_v57 }
 0x1c6   : > { %v2582_v4 = vunpack.i.h.bf16 %v2580_v59  ;;  %v2581_v53 = vunpack.i.l.bf16 %v2580_v59  ;;  %2119 = vmatprep.mubr.msk.f32.mxu1 %vm379_vm0, %v3261_v18 }
 0x1c8   : > { %v1266_v10 = vsel %vm1258_vm3, %v1249_v0, %v2582_v4  ;;  %v1265_v11 = vsel %vm1258_vm3, %v1248_v6, %v2581_v53  ;;  %v2595_v15 = vpop.permute.xlu1 %2594 }
 0x1c9   : > { %v2590_v16 = vpop.permute.xlu0 %2589  ;;  %1523 = vmatmul.mubr.f32.gmra.mrb[10].mxu1 %v1349_v12  ;;  %v2597_v18 = vunpack.i.h.bf16 %v2595_v15  ;;  %v2596_v17 = vunpack.i.l.bf16 %v2595_v15  ;;  %v1282_v1 = vsel %vm1275_vm4, %v1265_v11, %v2586_v9  ;;  %v1283_v13 = vsel %vm1275_vm4, %v1266_v10, %v2587_v7 }
 0x1ca   : > { %v2592_v22 = vunpack.i.h.bf16 %v2590_v16  ;;  %v2591_v23 = vunpack.i.l.bf16 %v2590_v16  ;;  %2120 = vmatprep.mubr.msk.f32.mxu1 %vm379_vm0, %v3268_v21 }
 0x1cc   : > { %v1299_v25 = vsel %vm1292_vm5, %v1282_v1, %v2591_v23  ;;  %v1300_v26 = vsel %vm1292_vm5, %v1283_v13, %v2592_v22  ;;  %v2605_v27 = vpop.permute.xlu1 %2604 }
 0x1cd   : > { %v2600_v29 = vpop.permute.xlu0 %2599  ;;  %v1316_v30 = vsel %vm1309_vm6, %v1299_v25, %v2596_v17  ;;  %v1317_v21 = vsel %vm1309_vm6, %v1300_v26, %v2597_v18  ;;  %v2606_v39 = vunpack.i.l.bf16 %v2605_v27  ;;  %v2607_v31 = vunpack.i.h.bf16 %v2605_v27 }
 0x1ce   : > { %v2601_v34 = vunpack.i.l.bf16 %v2600_v29  ;;  %v1333_v40 = vsel %vm1326_vm7, %v1316_v30, %v2556_v62  ;;  %v2602_v41 = vunpack.i.h.bf16 %v2600_v29  ;;  %v1334_v47 = vsel %vm1326_vm7, %v1317_v21, %v2557_v35 }
 0x1cf   : > { %v1350_v42 = vsel %vm1343_vm8, %v1333_v40, %v2561_v8  ;;  %v1351_v57 = vsel %vm1343_vm8, %v1334_v47, %v2562_v48 }
 0x1d0   : > { %v1250_v44 = vsel %vm379_vm0, %v657_v28, %v2601_v34  ;;  %1528 = vmatmul.mubr.f32.gmra.mrb[12].mxu1 %v1350_v42  ;;  %v2615_v60 = vpop.permute.xlu1 %2614  ;;  %v1251_v52 = vsel %vm379_vm0, %v3276_v32, %v2602_v41 }
 0x1d1   : > { %v2610_v2 = vpop.permute.xlu0 %2609  ;;  %2121 = vmatprep.mubr.msk.f32.mxu1 %vm379_vm0, %v785_v43  ;;  %v2616_v51 = vunpack.i.l.bf16 %v2615_v60  ;;  %v1267_v24 = vsel %vm1258_vm3, %v1250_v44, %v2606_v39  ;;  %v2617_v19 = vunpack.i.h.bf16 %v2615_v60  ;;  %v1268_v53 = vsel %vm1258_vm3, %v1251_v52, %v2607_v31 }
 0x1d2   : > { %v2611_v50 = vunpack.i.l.bf16 %v2610_v2  ;;  %v2612_v54 = vunpack.i.h.bf16 %v2610_v2 }
 0x1d4   : > { %v1284_v56 = vsel %vm1275_vm4, %v1267_v24, %v2611_v50  ;;  %1533 = vmatmul.mubr.f32.gmra.mrb[14].mxu1 %v1351_v57  ;;  %v2625_v59 = vpop.permute.xlu1 %2624  ;;  %v1285_v32 = vsel %vm1275_vm4, %v1268_v53, %v2612_v54 }
 0x1d5   : > { %v2620_v36 = vpop.permute.xlu0 %2619  ;;  %2122 = vmatprep.mubr.msk.f32.mxu1 %vm379_vm0, %v3286_v38  ;;  %v2626_v63 = vunpack.i.l.bf16 %v2625_v59  ;;  %v1301_v0 = vsel %vm1292_vm5, %v1284_v56, %v2616_v51  ;;  %v2627_v12 = vunpack.i.h.bf16 %v2625_v59  ;;  %v1302_v38 = vsel %vm1292_vm5, %v1285_v32, %v2617_v19 }
 0x1d6   : > { %v2621_v4 = vunpack.i.l.bf16 %v2620_v36  ;;  %v2622_v6 = vunpack.i.h.bf16 %v2620_v36 }
 0x1d8   : > { %v1318_v7 = vsel %vm1309_vm6, %v1301_v0, %v2621_v4  ;;  %v2635_v9 = vpop.permute.xlu1 %2634  ;;  %v1319_v22 = vsel %vm1309_vm6, %v1302_v38, %v2622_v6 }
 0x1d9   : > { %v2630_v10 = vpop.permute.xlu0 %2629  ;;  %v2636_v15 = vunpack.i.l.bf16 %v2635_v9  ;;  %v1335_v16 = vsel %vm1326_vm7, %v1318_v7, %v2626_v63  ;;  %v2637_v23 = vunpack.i.h.bf16 %v2635_v9  ;;  %v1336_v28 = vsel %vm1326_vm7, %v1319_v22, %v2627_v12 }
 0x1da   : > { %v2631_v11 = vunpack.i.l.bf16 %v2630_v10  ;;  %v2632_v18 = vunpack.i.h.bf16 %v2630_v10 }
 0x1db   : > { %v1252_v62 = vsel %vm379_vm0, %v3278_v33, %v2636_v15  ;;  %v1253_v8 = vsel %vm379_vm0, %v3284_v37, %v2637_v23 }
 0x1dc   : > { %v1352_v17 = vsel %vm1343_vm8, %v1335_v16, %v2631_v11  ;;  %v2645_v1 = vpop.permute.xlu1 %2644  ;;  %v1353_v30 = vsel %vm1343_vm8, %v1336_v28, %v2632_v18 }
 0x1dd   : > { %v2640_v13 = vpop.permute.xlu0 %2639  ;;  %1538 = vmatmul.mubr.f32.gmra.mrb[16].mxu1 %v1352_v17  ;;  %v2646_v27 = vunpack.i.l.bf16 %v2645_v1  ;;  %v2647_v34 = vunpack.i.h.bf16 %v2645_v1 }
 0x1de   : > { %v2642_v25 = vunpack.i.h.bf16 %v2640_v13  ;;  %v2641_v26 = vunpack.i.l.bf16 %v2640_v13  ;;  %2123 = vmatprep.mubr.msk.f32.mxu1 %vm379_vm0, %v3297_v46 }
 0x1e0   : > { %v1269_v29 = vsel %vm1258_vm3, %v1252_v62, %v2641_v26  ;;  %v2655_v21 = vpop.permute.xlu1 %2654  ;;  %v1270_v39 = vsel %vm1258_vm3, %v1253_v8, %v2642_v25  ;;  %v1594_v8 = vld [vmem:[%s3718_s5] sm:$0xff] }
 0x1e1   : > { %v2650_v35 = vpop.permute.xlu0 %2649  ;;  %1543 = vmatmul.mubr.f32.gmra.mrb[18].mxu1 %v1353_v30  ;;  %v2656_v33 = vunpack.i.l.bf16 %v2655_v21  ;;  %v1286_v43 = vsel %vm1275_vm4, %v1269_v29, %v2646_v27  ;;  %v2657_v44 = vunpack.i.h.bf16 %v2655_v21  ;;  %v1287_v42 = vsel %vm1275_vm4, %v1270_v39, %v2647_v34  ;;  %v1595_v34 = vld [vmem:[%s3718_s5 + $0x8] sm:$0xff] }
 0x1e2   : > { %v2652_v46 = vunpack.i.h.bf16 %v2650_v35  ;;  %v2651_v40 = vunpack.i.l.bf16 %v2650_v35  ;;  %2124 = vmatprep.mubr.msk.f32.mxu1 %vm379_vm0, %v3305_v49 }
 0x1e4   : > { %v1303_v41 = vsel %vm1292_vm5, %v1286_v43, %v2651_v40  ;;  %v2665_v37 = vpop.permute.xlu1 %2664  ;;  %v1304_v2 = vsel %vm1292_vm5, %v1287_v42, %v2652_v46  ;;  %v2343_v46 = vpack.c.bf16 %v1595_v34, %v1594_v8 }
 0x1e5   : > { %v2660_v60 = vpop.permute.xlu0 %2659  ;;  %v2666_v47 = vunpack.i.l.bf16 %v2665_v37  ;;  %v1320_v31 = vsel %vm1309_vm6, %v1303_v41, %v2656_v33  ;;  %v2667_v49 = vunpack.i.h.bf16 %v2665_v37  ;;  %v1321_v56 = vsel %vm1309_vm6, %v1304_v2, %v2657_v44 }
 0x1e6   : > { %v2662_v48 = vunpack.i.h.bf16 %v2660_v60  ;;  %v2661_v50 = vunpack.i.l.bf16 %v2660_v60  ;;  %2344 = vmatprep.subr.bf16.mxu0 %v2343_v46 }
 0x1e7   : > { %2346 = vmatpush3.bf16.msra.mxu0 %v2343_v46 }
 0x1e8   : > { %v1337_v51 = vsel %vm1326_vm7, %v1320_v31, %v2661_v50  ;;  %v2675_v24 = vpop.permute.xlu1 %2674  ;;  %v1338_v57 = vsel %vm1326_vm7, %v1321_v56, %v2662_v48 }
 0x1e9   : > { %v2670_v52 = vpop.permute.xlu0 %2669  ;;  %v1354_v54 = vsel %vm1343_vm8, %v1337_v51, %v2666_v47  ;;  %v1355_v19 = vsel %vm1343_vm8, %v1338_v57, %v2667_v49  ;;  %v2676_v53 = vunpack.i.l.bf16 %v2675_v24  ;;  %v2677_v9 = vunpack.i.h.bf16 %v2675_v24 }
 0x1ea   : > { %1548 = vmatmul.mubr.f32.gmra.mrb[20].mxu1 %v1354_v54  ;;  %v2671_v59 = vunpack.i.l.bf16 %v2670_v52  ;;  %v2672_v63 = vunpack.i.h.bf16 %v2670_v52 }
 0x1eb   : > { %2125 = vmatprep.mubr.msk.f32.mxu1 %vm379_vm0, %v3317_v58 }
 0x1ec   : > { %v2685_v36 = vpop.permute.xlu1 %2684  ;;  %v1254_v0 = vsel %vm379_vm0, %v3295_v45, %v2671_v59  ;;  %v1255_v58 = vsel %vm379_vm0, %v3311_v55, %v2672_v63 }
 0x1ed   : > { %v2680_v4 = vpop.permute.xlu0 %2679  ;;  %v2686_v10 = vunpack.i.l.bf16 %v2685_v36  ;;  %v1271_v12 = vsel %vm1258_vm3, %v1254_v0, %v2676_v53  ;;  %v1272_v17 = vsel %vm1258_vm3, %v1255_v58, %v2677_v9  ;;  %v1796_v0 = vld [vmem:[%s3720_s7] sm:$0xff] }
 0x1ee   : > { %1553 = vmatmul.mubr.f32.gmra.mrb[22].mxu1 %v1355_v19  ;;  %v2681_v32 = vunpack.i.l.bf16 %v2680_v4  ;;  %v2682_v11 = vunpack.i.h.bf16 %v2680_v4  ;;  %v793_v4 = vld [vmem:[#allocation2 + $0x132] sm:$0xff] }
 0x1ef   : > { %2126 = vmatprep.mubr.msk.f32.mxu1 %vm379_vm0, %v3331_v5  ;;  %v2687_v5 = vunpack.i.h.bf16 %v2685_v36 }
 0x1f0   : > { %v2695_v6 = vpop.permute.xlu1 %2694  ;;  %v1288_v15 = vsel %vm1275_vm4, %v1271_v12, %v2681_v32  ;;  %v1289_v45 = vsel %vm1275_vm4, %v1272_v17, %v2682_v11  ;;  %v1797_v32 = vld [vmem:[%s3720_s7 + $0x8] sm:$0xff] }
 0x1f1   : > { %v2690_v7 = vpop.permute.xlu0 %2689  ;;  %v2696_v22 = vunpack.i.l.bf16 %v2695_v6  ;;  %v1305_v23 = vsel %vm1292_vm5, %v1288_v15, %v2686_v10  ;;  %v1306_v62 = vsel %vm1292_vm5, %v1289_v45, %v2687_v5  ;;  %v2697_v27 = vunpack.i.h.bf16 %v2695_v6 }
 0x1f2   : > { %v2691_v16 = vunpack.i.l.bf16 %v2690_v7  ;;  %v2692_v1 = vunpack.i.h.bf16 %v2690_v7  ;;  %v2347_v6 = vpack.c.bf16 %v1797_v32, %v1796_v0  ;;  %v3538_v7 = vld [vmem:[%s3717_s4] ss:$0 sm:$0xff] }
 0x1f4   : > { %v2705_v38 = vpop.permute.xlu1 %2704  ;;  %v1322_v55 = vsel %vm1309_vm6, %v1305_v23, %v2691_v16  ;;  %v1323_v39 = vsel %vm1309_vm6, %v1306_v62, %v2692_v1  ;;  %2348 = vmatprep.subr.bf16.mxu0 %v2347_v6 }
 0x1f5   : > { %v1159_v18 = vpop.permute.xlu0 %1158  ;;  %v2707_v28 = vunpack.i.h.bf16 %v2705_v38  ;;  %v2706_v29 = vunpack.i.l.bf16 %v2705_v38  ;;  %v1339_v30 = vsel %vm1326_vm7, %v1322_v55, %v2696_v22  ;;  %v1340_v37 = vsel %vm1326_vm7, %v1323_v39, %v2697_v27 }
 0x1f7   : > { %v1257_v44 = vsel %vm379_vm0, %v3329_v3, %v2707_v28  ;;  %v1256_v42 = vsel %vm379_vm0, %v3323_v61, %v2706_v29 }
 0x1f8   : > { %v2715_v13 = vpop.permute.xlu1 %2714 }
 0x1f9   : > { %v2700_v25 = vpop.permute.xlu0 %2699  ;;  %v2717_v48 = vunpack.i.h.bf16 %v2715_v13  ;;  %v2716_v50 = vunpack.i.l.bf16 %v2715_v13 }
 0x1fa   : > { %v2701_v26 = vunpack.i.l.bf16 %v2700_v25  ;;  %v2702_v21 = vunpack.i.h.bf16 %v2700_v25 }
 0x1fc   : > { %v1356_v35 = vsel %vm1343_vm8, %v1339_v30, %v2701_v26  ;;  %v1095_v40 = vpop.permute.xlu1 %1094  ;;  %v1357_v47 = vsel %vm1343_vm8, %v1340_v37, %v2702_v21 }
 0x1fd   : > { %v2710_v33 = vpop.permute.xlu0 %2709  ;;  %1558 = vmatmul.mubr.f32.gmra.mrb[24].mxu1 %v1356_v35 }
 0x1fe   : > { %v2712_v43 = vunpack.i.h.bf16 %v2710_v33  ;;  %v2711_v41 = vunpack.i.l.bf16 %v2710_v33  ;;  %2127 = vmatprep.mubr.msk.f32.mxu1 %vm379_vm0, %v3344_v14 }
 0x200   : > { %v1274_v60 = vsel %vm1258_vm3, %v1257_v44, %v2712_v43  ;;  %v1273_v2 = vsel %vm1258_vm3, %v1256_v42, %v2711_v41  ;;  %v1223_v31 = vpop.permute.xlu1 %1222 }
 0x201   : > { %v2720_v14 = vpop.permute.xlu0 %2719  ;;  %1563 = vmatmul.mubr.f32.gmra.mrb[26].mxu1 %v1357_v47  ;;  %v1290_v61 = vsel %vm1275_vm4, %v1273_v2, %v2716_v50  ;;  %v1291_v3 = vsel %vm1275_vm4, %v1274_v60, %v2717_v48 }
 0x202   : > { %v2722_v51 = vunpack.i.h.bf16 %v2720_v14  ;;  %v2721_v49 = vunpack.i.l.bf16 %v2720_v14  ;;  %2128 = vmatprep.mubr.msk.f32.mxu1 %vm379_vm0, %v3355_v20 }
 0x204   : > { %v1307_v24 = vsel %vm1292_vm5, %v1290_v61, %v2721_v49  ;;  %v1308_v52 = vsel %vm1292_vm5, %v1291_v3, %v2722_v51  ;;  %v1161_v59 = vpop.permute.xlu1 %1160 }
 0x205   : > { %v1097_v54 = vpop.permute.xlu0 %1096  ;;  %v1324_v56 = vsel %vm1309_vm6, %v1307_v24, %v1095_v40 }
 0x206   : > { %v1325_v57 = vsel %vm1309_vm6, %v1308_v52, %v1097_v54  ;;  %v1341_v36 = vsel %vm1326_vm7, %v1324_v56, %v1159_v18 }
 0x207   : > { %v1358_v19 = vsel %vm1343_vm8, %v1341_v36, %v1223_v31  ;;  %v1342_v20 = vsel %vm1326_vm7, %v1325_v57, %v1161_v59 }
 0x208   : > { %1568 = vmatmul.mubr.f32.gmra.mrb[28].mxu1 %v1358_v19 }
 0x209   : > { %v1225_v53 = vpop.permute.xlu0 %1224  ;;  %2129 = vmatprep.mubr.msk.f32.mxu1 %vm379_vm0, %v793_v4 }
 0x20a   : > { %v1359_v63 = vsel %vm1343_vm8, %v1342_v20, %v1225_v53 }
 0x20c   : > { %1573 = vmatmul.mubr.f32.gmra.mrb[30].mxu1 %v1359_v63 }
 0x278   : > { %v1499_v9 = vpop.f32.mrb[0].mxu1 }
 0x279   : > { %v1500_v58 = vadd.f32 %v3538_v7, %v1499_v9  ;;  %v1501_v10 = vpop.f32.mrb[1].mxu1 }
 0x27a   : > { %v2724_v10 = vld [vmem:[%s3012_s19 + $0x8] sm:$0xff] }
 0x27b   : > { %v1578_v11 = vmax.f32 %v1500_v58, 0.0  ;;  %v2723_v58 = vld [vmem:[%s3012_s19] sm:$0xff] }
 0x27c   : > { %v1504_v12 = vpop.f32.mrb[2].mxu1 }
 0x27d   : > { %v1505_v15 = vadd.f32 %v3538_v7, %v1504_v12  ;;  %v1506_v16 = vpop.f32.mrb[3].mxu1  ;;  %2260 = vmatprep.mubr.msk.f32.mxu0 %vm379_vm0, %v1578_v11  ;;  %v2725_v11 = vld [vmem:[%s3012_s19 + $0x10] sm:$0xff]  ;;  %v2727_v12 = vld [vmem:[%s3012_s19 + $0x20] sm:$0xff] }
 0x27e   : > { %v2729_v16 = vld [vmem:[%s3012_s19 + $0x30] sm:$0xff] }
 0x27f   : > { %v1579_v38 = vmax.f32 %v1505_v15, 0.0  ;;  %v2728_v15 = vld [vmem:[%s3012_s19 + $0x28] sm:$0xff] }
 0x281   : > { %2261 = vmatmul.mubr.msk.f32.vlgmr.msra.gmra.mrb[16].mxu0 %vm379_vm0, %v1579_v38  ;;  %v2730_v38 = vld [vmem:[%s3012_s19 + $0x38] sm:$0xff] }
 0x282   : > { %2350 = vmatpush3.bf16.msra.mxu0 %v2347_v6 }
 0x285   : > { %v1509_v18 = vpop.f32.mrb[4].mxu1 }
 0x286   : > { %v1510_v5 = vadd.f32 %v3538_v7, %v1509_v18  ;;  %v1511_v17 = vpop.f32.mrb[5].mxu1  ;;  %v2731_v18 = vld [vmem:[%s3012_s19 + $0x40] sm:$0xff] }
 0x287   : > { %v2733_v17 = vld [vmem:[%s3012_s19 + $0x50] sm:$0xff] }
 0x288   : > { %v1580_v45 = vmax.f32 %v1510_v5, 0.0  ;;  %v2732_v5 = vld [vmem:[%s3012_s19 + $0x48] sm:$0xff] }
 0x289   : > { %v1514_v22 = vpop.f32.mrb[6].mxu1 }
 0x28a   : > { %v1515_v23 = vadd.f32 %v3538_v7, %v1514_v22  ;;  %v1516_v1 = vpop.f32.mrb[7].mxu1  ;;  %2263 = vmatprep.mubr.msk.f32.mxu0 %vm379_vm0, %v1580_v45  ;;  %v2734_v45 = vld [vmem:[%s3012_s19 + $0x58] sm:$0xff]  ;;  %v2735_v22 = vld [vmem:[%s3012_s19 + $0x60] sm:$0xff] }
 0x28b   : > { %v2737_v1 = vld [vmem:[%s3012_s19 + $0x70] sm:$0xff] }
 0x28c   : > { %v1581_v55 = vmax.f32 %v1515_v23, 0.0  ;;  %v2736_v23 = vld [vmem:[%s3012_s19 + $0x68] sm:$0xff] }
 0x28e   : > { %2264 = vmatmul.mubr.msk.f32.gmra.mrb[18].mxu0 %vm379_vm0, %v1581_v55  ;;  %v2738_v55 = vld [vmem:[%s3012_s19 + $0x78] sm:$0xff] }
 0x298   : > { %v1519_v13 = vpop.f32.mrb[8].mxu1 }
 0x299   : > { %v1520_v25 = vadd.f32 %v3538_v7, %v1519_v13  ;;  %v1521_v26 = vpop.f32.mrb[9].mxu1  ;;  %v2130_v13 = vld [vmem:[%s3719_s6] ss:$0 sm:$0xff] }
 0x29b   : > { %v1582_v62 = vmax.f32 %v1520_v25, 0.0  ;;  %v2147_v25 = vld [vmem:[%s3721_s8] ss:$0 sm:$0xff] }
 0x29c   : > { %v1524_v27 = vpop.f32.mrb[10].mxu1 }
 0x29d   : > { %v1525_v28 = vadd.f32 %v3538_v7, %v1524_v27  ;;  %v1526_v29 = vpop.f32.mrb[11].mxu1  ;;  %2266 = vmatprep.mubr.msk.f32.mxu0 %vm379_vm0, %v1582_v62  ;;  %v3610_v27 = vadd.f32 %v2147_v25, %v2130_v13 }
 0x29f   : > { %v1583_v30 = vmax.f32 %v1525_v28, 0.0 }
 0x2a1   : > { %2267 = vmatmul.mubr.msk.f32.gmra.mrb[20].mxu0 %vm379_vm0, %v1583_v30 }
 0x2a3   : > { %v1529_v8 = vpop.f32.mrb[12].mxu1 }
 0x2a4   : > { %v1530_v34 = vadd.f32 %v3538_v7, %v1529_v8  ;;  %v1531_v21 = vpop.f32.mrb[13].mxu1 }
 0x2a6   : > { %v1584_v35 = vmax.f32 %v1530_v34, 0.0 }
 0x2a7   : > { %v1534_v39 = vpop.f32.mrb[14].mxu1 }
 0x2a8   : > { %v1535_v46 = vadd.f32 %v3538_v7, %v1534_v39  ;;  %v1536_v40 = vpop.f32.mrb[15].mxu1  ;;  %2269 = vmatprep.mubr.msk.f32.mxu0 %vm379_vm0, %v1584_v35 }
 0x2aa   : > { %v1585_v33 = vmax.f32 %v1535_v46, 0.0 }
 0x2ac   : > { %2270 = vmatmul.mubr.msk.f32.gmra.mrb[22].mxu0 %vm379_vm0, %v1585_v33 }
 0x2b0   : > { %v1539_v43 = vpop.f32.mrb[16].mxu1 }
 0x2b1   : > { %v1540_v41 = vadd.f32 %v3538_v7, %v1539_v43  ;;  %v1541_v44 = vpop.f32.mrb[17].mxu1 }
 0x2b3   : > { %v1586_v42 = vmax.f32 %v1540_v41, 0.0 }
 0x2b4   : > { %v1544_v37 = vpop.f32.mrb[18].mxu1 }
 0x2b5   : > { %v1545_v60 = vadd.f32 %v3538_v7, %v1544_v37  ;;  %v1546_v2 = vpop.f32.mrb[19].mxu1  ;;  %2272 = vmatprep.mubr.msk.f32.mxu0 %vm379_vm0, %v1586_v42 }
 0x2b7   : > { %v1587_v47 = vmax.f32 %v1545_v60, 0.0 }
 0x2b9   : > { %2273 = vmatmul.mubr.msk.f32.gmra.mrb[24].mxu0 %vm379_vm0, %v1587_v47 }
 0x2bd   : > { %v1549_v48 = vpop.f32.mrb[20].mxu1 }
 0x2be   : > { %v1550_v50 = vadd.f32 %v3538_v7, %v1549_v48  ;;  %v1551_v31 = vpop.f32.mrb[21].mxu1 }
 0x2c0   : > { %v1588_v14 = vmax.f32 %v1550_v50, 0.0 }
 0x2c1   : > { %v1554_v51 = vpop.f32.mrb[22].mxu1 }
 0x2c2   : > { %v1555_v49 = vadd.f32 %v3538_v7, %v1554_v51  ;;  %v1556_v61 = vpop.f32.mrb[23].mxu1  ;;  %2275 = vmatprep.mubr.msk.f32.mxu0 %vm379_vm0, %v1588_v14 }
 0x2c4   : > { %v1589_v3 = vmax.f32 %v1555_v49, 0.0 }
 0x2c6   : > { %2276 = vmatmul.mubr.msk.f32.gmra.mrb[26].mxu0 %vm379_vm0, %v1589_v3 }
 0x2d0   : > { %v1559_v24 = vpop.f32.mrb[24].mxu1 }
 0x2d1   : > { %v1560_v52 = vadd.f32 %v3538_v7, %v1559_v24  ;;  %v1561_v54 = vpop.f32.mrb[25].mxu1 }
 0x2d3   : > { %v1590_v56 = vmax.f32 %v1560_v52, 0.0 }
 0x2d4   : > { %v1564_v57 = vpop.f32.mrb[26].mxu1 }
 0x2d5   : > { %v1565_v59 = vadd.f32 %v3538_v7, %v1564_v57  ;;  %v1566_v36 = vpop.f32.mrb[27].mxu1  ;;  %2278 = vmatprep.mubr.msk.f32.mxu0 %vm379_vm0, %v1590_v56 }
 0x2d7   : > { %v1591_v4 = vmax.f32 %v1565_v59, 0.0 }
 0x2d9   : > { %2279 = vmatmul.mubr.msk.f32.gmra.mrb[28].mxu0 %vm379_vm0, %v1591_v4 }
 0x2db   : > { %v1569_v19 = vpop.f32.mrb[28].mxu1 }
 0x2dc   : > { %v1570_v20 = vadd.f32 %v3538_v7, %v1569_v19  ;;  %v1571_v53 = vpop.f32.mrb[29].mxu1 }
 0x2de   : > { %v1592_v63 = vmax.f32 %v1570_v20, 0.0 }
 0x2df   : > { %v1574_v0 = vpop.f32.mrb[30].mxu1 }
 0x2e0   : > { %v1575_v32 = vadd.f32 %v3538_v7, %v1574_v0  ;;  %v1576_v6 = vpop.f32.mrb[31].mxu1  ;;  %2281 = vmatprep.mubr.msk.f32.mxu0 %vm379_vm0, %v1592_v63  ;;  %v2726_v7 = vld [vmem:[%s3012_s19 + $0x18] sm:$0xff]  ;;  %s3616_s19 = scalar_lea.vmem [#allocation6], %s2094_s23  ;;  %s2173_s23 = sshll.u32 %s2923_s13, 11 }
 0x2e1   : > { %s2013_s28 = sshll.u32 %s3616_s19, 4  ;;  %s3663_s17 = scalar_lea.hbm %s3722_s9, %s2173_s23  ;;  %s3665_s28 = int_to_ptr.vmem [resolvable:$true] %s2013_s28 }
 0x2e2   : > { %v1593_v9 = vmax.f32 %v1575_v32, 0.0  ;;  %s1999_s13 = scalar_lea.sflag [#allocation5], %s3006_s29  ;;  %s2769_s20 = scalar_lea.vmem %s3665_s28, 2048 }
 0x2e3   : > { %p2770_p6 = scmp.ne.s32.totalorder %s3665_s28, %s2769_s20  ;;  %p2776_p8 = scmp.lt.s32.totalorder %s3665_s28, %s2774_s26 }
 0x2e4   : > { %2282 = vmatmul.mubr.msk.f32.gmra.mrb[30].mxu0 %vm379_vm0, %v1593_v9  ;;  %p2777_p10 = scmp.lt.s32.totalorder %s2775_s25, %s2769_s20 }
 0x2e5   : > { %2288 = vmatprep.mubr.msk.f32.mxu0 %vm379_vm0, %v2723_v58  ;;  %p2771_p12 = pnand %p2770_p6, %p3729_p11 }
 0x2e6   : > { %p2778_p0 = por %p2777_p10, %p2776_p8 }
 0x2e7   : > { %p2772_p13 = pneg %p2771_p12 }
 0x2e8   : > { %2289 = vmatmul.mubr.msk.f32.vlgmr.msra.gmra.mrb[16].mxu0 %vm379_vm0, %v2724_v10 }
 0x2e9   : > { %2291 = vmatprep.mubr.msk.f32.mxu0 %vm379_vm0, %v2725_v11  ;;  %p2779_p2 = pnand %p2778_p0, %p2772_p13 }
 0x2ec   : > { %2292 = vmatmul.mubr.msk.f32.gmra.mrb[18].mxu0 %vm379_vm0, %v2726_v7 }
 0x2ed   : > { %2294 = vmatprep.mubr.msk.f32.mxu0 %vm379_vm0, %v2727_v12 }
 0x2f0   : > { %2295 = vmatmul.mubr.msk.f32.gmra.mrb[20].mxu0 %vm379_vm0, %v2728_v15 }
 0x2f1   : > { %2297 = vmatprep.mubr.msk.f32.mxu0 %vm379_vm0, %v2729_v16 }
 0x2f4   : > { %2298 = vmatmul.mubr.msk.f32.gmra.mrb[22].mxu0 %vm379_vm0, %v2730_v38 }
 0x2f5   : > { %2300 = vmatprep.mubr.msk.f32.mxu0 %vm379_vm0, %v2731_v18 }
 0x2f8   : > { %2301 = vmatmul.mubr.msk.f32.gmra.mrb[24].mxu0 %vm379_vm0, %v2732_v5 }
 0x2f9   : > { %2303 = vmatprep.mubr.msk.f32.mxu0 %vm379_vm0, %v2733_v17 }
 0x2fc   : > { %2304 = vmatmul.mubr.msk.f32.gmra.mrb[26].mxu0 %vm379_vm0, %v2734_v45 }
 0x2fd   : > { %2306 = vmatprep.mubr.msk.f32.mxu0 %vm379_vm0, %v2735_v22 }
 0x300   : > { %2307 = vmatmul.mubr.msk.f32.gmra.mrb[28].mxu0 %vm379_vm0, %v2736_v23 }
 0x301   : > { %2309 = vmatprep.mubr.msk.f32.mxu0 %vm379_vm0, %v2737_v1 }
 0x304   : > { %2310 = vmatmul.mubr.msk.f32.gmra.mrb[30].mxu0 %vm379_vm0, %v2738_v55 }
 0x3bb   : > { %v2290_v26 = vpop.f32.mrb[16].mxu0 }
 0x3bc   : > { %v2351_v62 = vadd.f32 %v2290_v26, %v2130_v13  ;;  %v1871_v28 = vpop.f32.mrb[17].mxu0 }
 0x3bd   : > { %v2353_v29 = vadd.f32 %v2130_v13, %v1871_v28 }
 0x3be   : > { %v2352_v30 = vadd.f32 %v2351_v62, %v2147_v25 }
 0x3bf   : > { %v2354_v8 = vadd.f32 %v2353_v29, %v2147_v25  ;;  %v2293_v34 = vpop.f32.mrb[18].mxu0 }
 0x3c0   : > { %v1967_v21 = vmax.f32 %v2352_v30, 0.0  ;;  %v2356_v35 = vadd.f32 %v3610_v27, %v2293_v34  ;;  %v1881_v39 = vpop.f32.mrb[19].mxu0 }
 0x3c1   : > { %v1966_v46 = vmax.f32 %v2354_v8, 0.0  ;;  %v2358_v40 = vadd.f32 %v3610_v27, %v1881_v39 }
 0x3c2   : > { %1983 = vst.msk [vmem:[%s3616_s19 + $0x8] sm:$0xff] %vm1258_vm3, %v1967_v21  ;;  %v1969_v33 = vmax.f32 %v2356_v35, 0.0 }
 0x3c3   : > { %1982 = vst.msk [vmem:[%s3616_s19] sm:$0xff] %vm1258_vm3, %v1966_v46  ;;  %v1968_v43 = vmax.f32 %v2358_v40, 0.0  ;;  %v2296_v41 = vpop.f32.mrb[20].mxu0 }
 0x3c4   : > { %1985 = vst.msk [vmem:[%s3616_s19 + $0x18] sm:$0xff] %vm1258_vm3, %v1969_v33  ;;  %v2360_v44 = vadd.f32 %v3610_v27, %v2296_v41  ;;  %v1891_v42 = vpop.f32.mrb[21].mxu0 }
 0x3c5   : > { %1984 = vst.msk [vmem:[%s3616_s19 + $0x10] sm:$0xff] %vm1258_vm3, %v1968_v43  ;;  %v2362_v37 = vadd.f32 %v3610_v27, %v1891_v42 }
 0x3c6   : > { %v1971_v60 = vmax.f32 %v2360_v44, 0.0 }
 0x3c7   : > { %v1970_v2 = vmax.f32 %v2362_v37, 0.0  ;;  %v2299_v47 = vpop.f32.mrb[22].mxu0 }
 0x3c8   : > { %1987 = vst.msk [vmem:[%s3616_s19 + $0x28] sm:$0xff] %vm1258_vm3, %v1971_v60  ;;  %v2364_v48 = vadd.f32 %v3610_v27, %v2299_v47  ;;  %v1901_v50 = vpop.f32.mrb[23].mxu0 }
 0x3c9   : > { %1986 = vst.msk [vmem:[%s3616_s19 + $0x20] sm:$0xff] %vm1258_vm3, %v1970_v2  ;;  %v2366_v31 = vadd.f32 %v3610_v27, %v1901_v50 }
 0x3ca   : > { %v1973_v14 = vmax.f32 %v2364_v48, 0.0 }
 0x3cb   : > { %v1972_v51 = vmax.f32 %v2366_v31, 0.0  ;;  %v2302_v49 = vpop.f32.mrb[24].mxu0 }
 0x3cc   : > { %1989 = vst.msk [vmem:[%s3616_s19 + $0x38] sm:$0xff] %vm1258_vm3, %v1973_v14  ;;  %v2368_v61 = vadd.f32 %v3610_v27, %v2302_v49  ;;  %v1911_v3 = vpop.f32.mrb[25].mxu0 }
 0x3cd   : > { %1988 = vst.msk [vmem:[%s3616_s19 + $0x30] sm:$0xff] %vm1258_vm3, %v1972_v51  ;;  %v2370_v24 = vadd.f32 %v3610_v27, %v1911_v3 }
 0x3ce   : > { %v1975_v52 = vmax.f32 %v2368_v61, 0.0 }
 0x3cf   : > { %v1974_v54 = vmax.f32 %v2370_v24, 0.0  ;;  %v2305_v56 = vpop.f32.mrb[26].mxu0 }
 0x3d0   : > { %1991 = vst.msk [vmem:[%s3616_s19 + $0x48] sm:$0xff] %vm1258_vm3, %v1975_v52  ;;  %v2372_v57 = vadd.f32 %v3610_v27, %v2305_v56  ;;  %v1921_v59 = vpop.f32.mrb[27].mxu0 }
 0x3d1   : > { %1990 = vst.msk [vmem:[%s3616_s19 + $0x40] sm:$0xff] %vm1258_vm3, %v1974_v54  ;;  %v2374_v36 = vadd.f32 %v3610_v27, %v1921_v59 }
 0x3d2   : > { %v1977_v4 = vmax.f32 %v2372_v57, 0.0 }
 0x3d3   : > { %v1976_v19 = vmax.f32 %v2374_v36, 0.0  ;;  %v2308_v20 = vpop.f32.mrb[28].mxu0 }
 0x3d4   : > { %1993 = vst.msk [vmem:[%s3616_s19 + $0x58] sm:$0xff] %vm1258_vm3, %v1977_v4  ;;  %v2376_v53 = vadd.f32 %v3610_v27, %v2308_v20  ;;  %v1931_v63 = vpop.f32.mrb[29].mxu0 }
 0x3d5   : > { %1992 = vst.msk [vmem:[%s3616_s19 + $0x50] sm:$0xff] %vm1258_vm3, %v1976_v19  ;;  %v2378_v0 = vadd.f32 %v3610_v27, %v1931_v63 }
 0x3d6   : > { %v1979_v32 = vmax.f32 %v2376_v53, 0.0 }
 0x3d7   : > { %v1978_v6 = vmax.f32 %v2378_v0, 0.0  ;;  %v2311_v9 = vpop.f32.mrb[30].mxu0 }
 0x3d8   : > { %1995 = vst.msk [vmem:[%s3616_s19 + $0x68] sm:$0xff] %vm1258_vm3, %v1979_v32  ;;  %v2380_v58 = vadd.f32 %v3610_v27, %v2311_v9  ;;  %v1941_v10 = vpop.f32.mrb[31].mxu0 }
 0x3d9   : > { %1994 = vst.msk [vmem:[%s3616_s19 + $0x60] sm:$0xff] %vm1258_vm3, %v1978_v6  ;;  %v2382_v11 = vadd.f32 %v3610_v27, %v1941_v10 }
 0x3da   : > { %v1981_v7 = vmax.f32 %v2380_v58, 0.0 }
 0x3db   : > { %v1980_v12 = vmax.f32 %v2382_v11, 0.0 }
 0x3dc   : > { %1997 = vst.msk [vmem:[%s3616_s19 + $0x78] sm:$0xff] %vm1258_vm3, %v1981_v7 }
 0x3dd   : > { %1996 = vst.msk [vmem:[%s3616_s19 + $0x70] sm:$0xff] %vm1258_vm3, %v1980_v12 }
 0x3de   : > { %2782 = shalt.err (!%p2779_p2)
}
 0x3df   : > { %s2783_s24 = scalar_lea.hbm %s3663_s17, 2048  ;;  %s2787_s14 = scalar_lea.hbm %s3722_s9, 4096 }
 0x3e0   : > { %p2784_p4 = scmp.ne.s32.totalorder %s3663_s17, %s2783_s24  ;;  %p2788_p9 = scmp.lt.u32.totalorder %s3663_s17, %s3722_s9 }
 0x3e1   : > { %p2789_p1 = scmp.lt.u32.totalorder %s2787_s14, %s2783_s24  ;;  %p2791_p6 = scmp.lt.u32.totalorder %s2783_s24, %s3663_s17 }
 0x3e2   : > { %p2785_p5 = pnand %p2784_p4, %p3729_p11 }
 0x3e3   : > { %p2790_p3 = por %p2789_p1, %p2788_p9 }
 0x3e4   : > { %p2786_p7 = pneg %p2785_p5 }
 0x3e5   : > { %p2792_p12 = por %p2791_p6, %p2790_p3 }
 0x3e7   : > { %p2793_p13 = pnand %p2792_p12, %p2786_p7 }
 0x3e9   : > { %2796 = shalt.err (!%p2793_p13)
}
 0x3ea   : > { %s2850_s20 = smov 128   ;;  %s2851_s26 = smov 8  }
 0x3eb   : > { %2401 = dma.vmem_to_hbm [thread:$0]  (%p3729_p11), %s3665_s28, 2048, %s3663_s17, %s1999_s13, %s2850_s20, %s2850_s20, %s2851_s26  }
 0x3ec PF: > { %s2028_s25 = sand.u32 1, %s2823_s30   ;;  %p3730_p8 = scmp.ne.s32.totalorder %s3727_s22, 0 }
 0x3ed   : > { %p3731_p10 = scmp.ge.s32.totalorder %s2835_s12, 2  ;;  %s2029_s24 = scalar_lea.sflag [#allocation5], %s2028_s25 }
 0x3ef   : > { %p2408_p0 = pnand %p3731_p10, %p3730_p8 }
 0x3f1   : > { %2818 = dma.done.wait (!%p2408_p0), %s2029_s24, 2048  }
 0x3f2   : > { %2820 = vsyncadd (!%p2408_p0), %s2029_s24, 4294965248  ;;  %p22_p2 = scmp.ge.s32.totalorder %s2927_s15, 4   ;;  %s3732_s30 = smov %s2827_s10 }
 0x3f3   : > { %s3733_s10 = smov %s2831_s11  ;;  %s3734_s11 = smov %s2939_s18 }
 0x3f4   : > { %s3735_s12 = smov %s2927_s15  ;;  %24 = sbr.rel (!%p22_p2) target bundleno = 5 (0x5), region = 104 }
 0x3fb   :  { %2034 = vsyncpa [#allocation4], 1 }
 0x3fc   :  { %2036 = vsyncpa [#allocation4 + $0x1], 1 }
 0x3fd   :  { %2037 = vsyncpa [#allocation5], 1 }
 0x3fe   :  { %2039 = vsyncpa [#allocation5 + $0x1], 1 }

</bundles_post_ra>
